<compile_context>
chip_gen: v7x
topology: tpu7x:2x2x1
jax: 0.10.0
libtpu: 0.0.40
codegen_flags: <defaults>
</compile_context>

<pallas_src>
import functools

import jax
import jax.numpy as jnp
from jax.experimental import pallas as pl
from jax.experimental.pallas import tpu as pltpu


def _weightdrop_lstm_kernel(x_ref, wih_ref, whh_ref, b_ref, u_ref,
                            y_ref, hn_ref, cn_ref,
                            w_sc, gx_sc, h_sc, c_sc,
                            *, hidden, seq_len, batch, p, apply_dropout,
                            matmul_dtype):
    H, T, B = hidden, seq_len, batch

    # ---- WeightDrop._setweights(): DropConnect on W_hh^T, fused in-kernel ----
    if apply_dropout:
        scale = 1.0 / (1.0 - p)
        w_sc[...] = jnp.where(u_ref[...] >= p,
                              whh_ref[...] * scale, 0.0).astype(w_sc.dtype)
    else:
        w_sc[...] = whh_ref[...].astype(w_sc.dtype)

    # ---- input projection hoisted out of the recurrence: one big matmul ----
    x2 = x_ref[...].reshape(T * B, -1).astype(matmul_dtype)      # (T*B, D)
    gx_sc[...] = (
        jnp.dot(x2, wih_ref[...].astype(matmul_dtype),
                preferred_element_type=jnp.float32)
        + b_ref[...]                                             # (1,4H) broadcast
    )                                                            # (T*B, 4H)

    # ---- recurrence over time, all inside one kernel invocation ----
    h_sc[...] = jnp.zeros_like(h_sc)
    c_sc[...] = jnp.zeros_like(c_sc)

    # scale the g-block by 2 so tanh(g) = 2*sigmoid(2g) - 1 comes from the same
    # single exp over the full (B, 4H) gate tensor (one EUP push per step).
    col = jax.lax.broadcasted_iota(jnp.int32, (1, 4 * H), 1)
    gate_scale = jnp.where((col >= 2 * H) & (col < 3 * H), 2.0, 1.0)

    def step(t, carry):
        gates = gx_sc[pl.ds(t * B, B), :] + jnp.dot(
            h_sc[...].astype(matmul_dtype), w_sc[...],
            preferred_element_type=jnp.float32)                  # (B, 4H)
        s = 1.0 / (1.0 + jnp.exp(-(gates * gate_scale)))         # one wide exp
        i = s[:, 0 * H:1 * H]
        f = s[:, 1 * H:2 * H]
        g = 2.0 * s[:, 2 * H:3 * H] - 1.0                        # tanh(g)
        o = s[:, 3 * H:4 * H]

        c_new = f * c_sc[...] + i * g
        h_new = o * jnp.tanh(c_new)
        c_sc[...] = c_new
        h_sc[...] = h_new
        y_ref[t] = h_new.astype(y_ref.dtype)
        return carry

    jax.lax.fori_loop(0, T, step, 0)

    hn_ref[...] = h_sc[...].astype(hn_ref.dtype)
    cn_ref[...] = c_sc[...].astype(cn_ref.dtype)


def weightdrop_lstm_forward(x, w_ih_t, w_hh_raw_t, bias, u, *, hidden, dropout,
                            training, matmul_dtype=jnp.float32):
    """Fused WeightDrop(LSTM) forward. x: (T,B,D); returns y, (h_n, c_n)."""
    T, B, D = x.shape
    H = hidden
    apply_dropout = bool(training) and float(dropout) > 0.0

    kernel = functools.partial(
        _weightdrop_lstm_kernel, hidden=H, seq_len=T, batch=B,
        p=float(dropout), apply_dropout=apply_dropout, matmul_dtype=matmul_dtype)

    vmem = pltpu.MemorySpace.VMEM
    y, h_n, c_n = pl.pallas_call(
        kernel,
        out_shape=(
            jax.ShapeDtypeStruct((T, B, H), x.dtype),
            jax.ShapeDtypeStruct((B, H), x.dtype),
            jax.ShapeDtypeStruct((B, H), x.dtype),
        ),
        in_specs=[pl.BlockSpec(memory_space=vmem)] * 5,
        out_specs=(
            pl.BlockSpec(memory_space=vmem),
            pl.BlockSpec(memory_space=vmem),
            pl.BlockSpec(memory_space=vmem),
        ),
        scratch_shapes=[
            pltpu.VMEM((H, 4 * H), matmul_dtype),   # dropped W_hh^T (resident)
            pltpu.VMEM((T * B, 4 * H), jnp.float32),  # hoisted x@W_ih^T + b
            pltpu.VMEM((B, H), jnp.float32),        # h carry
            pltpu.VMEM((B, H), jnp.float32),        # c carry
        ],
    )(x, w_ih_t, w_hh_raw_t, bias, u)
    return y, (h_n, c_n)


class WeightDrop:
    """Mirrors torch WeightDrop(nn.LSTM(D, H), weights=('weight_hh_l0',), p)."""

    def __init__(self, w_ih, w_hh_raw, b_ih, b_hh, hidden, dropout=0.25):
        self.hidden = hidden
        self.dropout = dropout
        self.w_ih_t = jnp.asarray(w_ih).T                   # (D, 4H)
        self.weight_hh_l0_raw_t = jnp.asarray(w_hh_raw).T   # (H, 4H)
        self.bias = (jnp.asarray(b_ih) + jnp.asarray(b_hh)).reshape(1, 4 * hidden)
        self.training = True

    def forward(self, x, key, matmul_dtype=jnp.float32):
        H = self.hidden
        # Uniform draws for the DropConnect mask; the mask itself is applied to
        # W_hh inside the fused kernel.
        # TODO(synk): mask draw will not match torch's RNG bit-for-bit (same
        # Bernoulli(1-p) semantics with inverted scaling).
        u = jax.random.uniform(key, (H, 4 * H), jnp.float32)
        out = weightdrop_lstm_forward(
            x, self.w_ih_t, self.weight_hh_l0_raw_t, self.bias, u,
            hidden=H, dropout=self.dropout, training=self.training,
            matmul_dtype=matmul_dtype)
        return out, u


if __name__ == "__main__":
    T, B, D, H = 8, 8, 32, 128
    p = 0.25

    key = jax.random.PRNGKey(0)
    k1, k2, k3, k4, k5, k_mask = jax.random.split(key, 6)
    s = 1.0 / jnp.sqrt(H)
    # PyTorch nn.LSTM parameter shapes
    w_ih = jax.random.uniform(k1, (4 * H, D), jnp.float32, -s, s)      # weight_ih_l0
    w_hh_raw = jax.random.uniform(k2, (4 * H, H), jnp.float32, -s, s)  # weight_hh_l0_raw
    b_ih = jax.random.uniform(k3, (4 * H,), jnp.float32, -s, s)
    b_hh = jax.random.uniform(k4, (4 * H,), jnp.float32, -s, s)
    x = jax.random.normal(k5, (T, B, D), jnp.float32)

    model = WeightDrop(w_ih, w_hh_raw, b_ih, b_hh, hidden=H, dropout=p)
    (y, (h_n, c_n)), u = model.forward(x, k_mask)
    jax.block_until_ready((y, h_n, c_n))

    # ---- pure-JAX reference (same uniforms -> same DropConnect mask) ----
    def ref_forward(x, wih_t, whh_raw_t, b, u, p):
        scale = 1.0 / (1.0 - p)
        whh_t = jnp.where(u >= p, whh_raw_t * scale, 0.0)
        hi = jax.lax.Precision.HIGHEST

        def step(carry, xt):
            h, c = carry
            g = (jnp.dot(xt, wih_t, precision=hi)
                 + jnp.dot(h, whh_t, precision=hi) + b[0])
            i = jax.nn.sigmoid(g[:, :H])
            f = jax.nn.sigmoid(g[:, H:2 * H])
            gg = jnp.tanh(g[:, 2 * H:3 * H])
            o = jax.nn.sigmoid(g[:, 3 * H:])
            c = f * c + i * gg
            h = o * jnp.tanh(c)
            return (h, c), h

        init = (jnp.zeros((B, H), jnp.float32), jnp.zeros((B, H), jnp.float32))
        (hf, cf), ys = jax.lax.scan(step, init, x)
        return ys, hf, cf

    y_r, h_r, c_r = ref_forward(x, model.w_ih_t, model.weight_hh_l0_raw_t,
                                model.bias, u, p)
    assert jnp.allclose(y, y_r, atol=1e-4, rtol=1e-4)
    assert jnp.allclose(h_n, h_r, atol=1e-4, rtol=1e-4)
    assert jnp.allclose(c_n, c_r, atol=1e-4, rtol=1e-4)

    print("KERNEL_OK")
</pallas_src>

<mosaic_0001>
module attributes {stable_mosaic.version = 11 : i64} {
  func.func @_weightdrop_lstm_kernel(%arg0: memref<8x8x32xf32, #tpu.memory_space<vmem>>, %arg1: memref<32x512xf32, #tpu.memory_space<vmem>>, %arg2: memref<128x512xf32, #tpu.memory_space<vmem>>, %arg3: memref<1x512xf32, #tpu.memory_space<vmem>>, %arg4: memref<128x512xf32, #tpu.memory_space<vmem>>, %arg5: memref<8x8x128xf32, #tpu.memory_space<vmem>>, %arg6: memref<8x128xf32, #tpu.memory_space<vmem>>, %arg7: memref<8x128xf32, #tpu.memory_space<vmem>>, %arg8: memref<128x512xf32, #tpu.memory_space<vmem>>, %arg9: memref<64x512xf32, #tpu.memory_space<vmem>>, %arg10: memref<8x128xf32, #tpu.memory_space<vmem>>, %arg11: memref<8x128xf32, #tpu.memory_space<vmem>>) attributes {dimension_semantics = [], scalar_prefetch = 0 : i64, scratch_operands = 4 : i64, tpu.core_type = #tpu.core_type<tc>} {
    %c0 = arith.constant 0 : index
    %c0_0 = arith.constant 0 : index
    %0 = vector.load %arg4[%c0, %c0_0] : memref<128x512xf32, #tpu.memory_space<vmem>>, vector<128x512xf32>
    %cst = arith.constant 2.500000e-01 : f32
    %1 = vector.broadcast %cst : f32 to vector<128x512xf32>
    %2 = arith.cmpf oge, %0, %1 : vector<128x512xf32>
    %c0_1 = arith.constant 0 : index
    %c0_2 = arith.constant 0 : index
    %3 = vector.load %arg2[%c0_1, %c0_2] : memref<128x512xf32, #tpu.memory_space<vmem>>, vector<128x512xf32>
    %cst_3 = arith.constant 1.33333337 : f32
    %4 = vector.broadcast %cst_3 : f32 to vector<128x512xf32>
    %5 = arith.mulf %3, %4 : vector<128x512xf32>
    %cst_4 = arith.constant 0.000000e+00 : f32
    %6 = vector.broadcast %cst_4 : f32 to vector<128x512xf32>
    %7 = arith.select %2, %5, %6 : vector<128x512xi1>, vector<128x512xf32>
    %c0_5 = arith.constant 0 : index
    %c0_6 = arith.constant 0 : index
    %8 = vector.load %arg8[%c0_5, %c0_6] : memref<128x512xf32, #tpu.memory_space<vmem>>, vector<128x512xf32>
    tpu.vector_store %arg8[%c0_5, %c0_6], %7 {strides = array<i32>} : memref<128x512xf32, #tpu.memory_space<vmem>>, vector<128x512xf32>,
    %c0_7 = arith.constant 0 : index
    %c0_8 = arith.constant 0 : index
    %c0_9 = arith.constant 0 : index
    %9 = vector.load %arg0[%c0_7, %c0_8, %c0_9] : memref<8x8x32xf32, #tpu.memory_space<vmem>>, vector<8x8x32xf32>
    %10 = vector.shape_cast %9 : vector<8x8x32xf32> to vector<64x32xf32>
    %c0_10 = arith.constant 0 : index
    %c0_11 = arith.constant 0 : index
    %11 = vector.load %arg1[%c0_10, %c0_11] : memref<32x512xf32, #tpu.memory_space<vmem>>, vector<32x512xf32>
    %cst_12 = arith.constant dense<0.000000e+00> : vector<64x512xf32>
    %12 = tpu.matmul %10, %11, %cst_12 {dimension_numbers = #tpu.dot_dimension_numbers<[1], [0], [0], [1], [0, 0, 1, 1], [], []>} : vector<64x32xf32>, vector<32x512xf32>, vector<64x512xf32> -> vector<64x512xf32>
    %c0_13 = arith.constant 0 : index
    %c0_14 = arith.constant 0 : index
    %13 = vector.load %arg3[%c0_13, %c0_14] : memref<1x512xf32, #tpu.memory_space<vmem>>, vector<1x512xf32>
    %14 = vector.broadcast %13 : vector<1x512xf32> to vector<64x512xf32>
    %15 = arith.addf %12, %14 : vector<64x512xf32>
    %c0_15 = arith.constant 0 : index
    %c0_16 = arith.constant 0 : index
    %16 = vector.load %arg9[%c0_15, %c0_16] : memref<64x512xf32, #tpu.memory_space<vmem>>, vector<64x512xf32>
    tpu.vector_store %arg9[%c0_15, %c0_16], %15 {strides = array<i32>} : memref<64x512xf32, #tpu.memory_space<vmem>>, vector<64x512xf32>,
    %cst_17 = arith.constant 0.000000e+00 : f32
    %17 = vector.broadcast %cst_17 : f32 to vector<8x128xf32>
    %c0_18 = arith.constant 0 : index
    %c0_19 = arith.constant 0 : index
    %18 = vector.load %arg10[%c0_18, %c0_19] : memref<8x128xf32, #tpu.memory_space<vmem>>, vector<8x128xf32>
    tpu.vector_store %arg10[%c0_18, %c0_19], %17 {strides = array<i32>} : memref<8x128xf32, #tpu.memory_space<vmem>>, vector<8x128xf32>,
    %cst_20 = arith.constant 0.000000e+00 : f32
    %19 = vector.broadcast %cst_20 : f32 to vector<8x128xf32>
    %c0_21 = arith.constant 0 : index
    %c0_22 = arith.constant 0 : index
    %20 = vector.load %arg11[%c0_21, %c0_22] : memref<8x128xf32, #tpu.memory_space<vmem>>, vector<8x128xf32>
    tpu.vector_store %arg11[%c0_21, %c0_22], %19 {strides = array<i32>} : memref<8x128xf32, #tpu.memory_space<vmem>>, vector<8x128xf32>,
    %21 = tpu.iota {dimensions = array<i32: 1>} : vector<1x512xi32>
    %c256_i32 = arith.constant 256 : i32
    %22 = vector.broadcast %c256_i32 : i32 to vector<1x512xi32>
    %23 = arith.cmpi sge, %21, %22 : vector<1x512xi32>
    %c384_i32 = arith.constant 384 : i32
    %24 = vector.broadcast %c384_i32 : i32 to vector<1x512xi32>
    %25 = arith.cmpi slt, %21, %24 : vector<1x512xi32>
    %26 = arith.andi %23, %25 : vector<1x512xi1>
    %cst_23 = arith.constant 2.000000e+00 : f32
    %cst_24 = arith.constant 1.000000e+00 : f32
    %27 = vector.broadcast %cst_23 : f32 to vector<1x512xf32>
    %28 = vector.broadcast %cst_24 : f32 to vector<1x512xf32>
    %29 = arith.select %26, %27, %28 : vector<1x512xi1>, vector<1x512xf32>
    %c0_i32 = arith.constant 0 : i32
    %c8_i32 = arith.constant 8 : i32
    %30 = arith.addi %c0_i32, %c8_i32 : i32
    %c1_i32 = arith.constant 1 : i32
    scf.for %arg12 = %c0_i32 to %30 step %c1_i32  : i32 {
      %c8_i32_34 = arith.constant 8 : i32
      %35 = arith.muli %arg12, %c8_i32_34 : i32
      %36 = arith.index_cast %35 : i32 to index
      %c0_35 = arith.constant 0 : index
      %37 = vector.load %arg9[%36, %c0_35] : memref<64x512xf32, #tpu.memory_space<vmem>>, vector<8x512xf32>
      %c0_36 = arith.constant 0 : index
      %c0_37 = arith.constant 0 : index
      %38 = vector.load %arg10[%c0_36, %c0_37] : memref<8x128xf32, #tpu.memory_space<vmem>>, vector<8x128xf32>
      %c0_38 = arith.constant 0 : index
      %c0_39 = arith.constant 0 : index
      %39 = vector.load %arg8[%c0_38, %c0_39] : memref<128x512xf32, #tpu.memory_space<vmem>>, vector<128x512xf32>
      %cst_40 = arith.constant dense<0.000000e+00> : vector<8x512xf32>
      %40 = tpu.matmul %38, %39, %cst_40 {dimension_numbers = #tpu.dot_dimension_numbers<[1], [0], [0], [1], [0, 0, 1, 1], [], []>} : vector<8x128xf32>, vector<128x512xf32>, vector<8x512xf32> -> vector<8x512xf32>
      %41 = arith.addf %37, %40 : vector<8x512xf32>
      %42 = vector.broadcast %29 : vector<1x512xf32> to vector<8x512xf32>
      %43 = arith.mulf %41, %42 : vector<8x512xf32>
      %cst_41 = arith.constant 0.000000e+00 : f32
      %44 = vector.broadcast %cst_41 : f32 to vector<8x512xf32>
      %45 = arith.subf %44, %43 : vector<8x512xf32>
      %46 = math.exp %45 : vector<8x512xf32>
      %cst_42 = arith.constant 1.000000e+00 : f32
      %47 = vector.broadcast %cst_42 : f32 to vector<8x512xf32>
      %48 = arith.addf %47, %46 : vector<8x512xf32>
      %cst_43 = arith.constant 1.000000e+00 : f32
      %49 = vector.broadcast %cst_43 : f32 to vector<8x512xf32>
      %50 = arith.divf %49, %48 : vector<8x512xf32>
      %51 = vector.extract_strided_slice %50 {offsets = [0, 0], sizes = [8, 128], strides = [1, 1]} : vector<8x512xf32> to vector<8x128xf32>
      %52 = vector.extract_strided_slice %50 {offsets = [0, 128], sizes = [8, 128], strides = [1, 1]} : vector<8x512xf32> to vector<8x128xf32>
      %53 = vector.extract_strided_slice %50 {offsets = [0, 256], sizes = [8, 128], strides = [1, 1]} : vector<8x512xf32> to vector<8x128xf32>
      %cst_44 = arith.constant 2.000000e+00 : f32
      %54 = vector.broadcast %cst_44 : f32 to vector<8x128xf32>
      %55 = arith.mulf %54, %53 : vector<8x128xf32>
      %cst_45 = arith.constant 1.000000e+00 : f32
      %56 = vector.broadcast %cst_45 : f32 to vector<8x128xf32>
      %57 = arith.subf %55, %56 : vector<8x128xf32>
      %58 = vector.extract_strided_slice %50 {offsets = [0, 384], sizes = [8, 128], strides = [1, 1]} : vector<8x512xf32> to vector<8x128xf32>
      %c0_46 = arith.constant 0 : index
      %c0_47 = arith.constant 0 : index
      %59 = vector.load %arg11[%c0_46, %c0_47] : memref<8x128xf32, #tpu.memory_space<vmem>>, vector<8x128xf32>
      %60 = arith.mulf %52, %59 : vector<8x128xf32>
      %61 = arith.mulf %51, %57 : vector<8x128xf32>
      %62 = arith.addf %60, %61 : vector<8x128xf32>
      %63 = math.tanh %62 : vector<8x128xf32>
      %64 = arith.mulf %58, %63 : vector<8x128xf32>
      %c0_48 = arith.constant 0 : index
      %c0_49 = arith.constant 0 : index
      %65 = vector.load %arg11[%c0_48, %c0_49] : memref<8x128xf32, #tpu.memory_space<vmem>>, vector<8x128xf32>
      tpu.vector_store %arg11[%c0_48, %c0_49], %62 {strides = array<i32>} : memref<8x128xf32, #tpu.memory_space<vmem>>, vector<8x128xf32>,
      %c0_50 = arith.constant 0 : index
      %c0_51 = arith.constant 0 : index
      %66 = vector.load %arg10[%c0_50, %c0_51] : memref<8x128xf32, #tpu.memory_space<vmem>>, vector<8x128xf32>
      tpu.vector_store %arg10[%c0_50, %c0_51], %64 {strides = array<i32>} : memref<8x128xf32, #tpu.memory_space<vmem>>, vector<8x128xf32>,
      %67 = arith.index_cast %arg12 : i32 to index
      %c0_52 = arith.constant 0 : index
      %c0_53 = arith.constant 0 : index
      %68 = vector.load %arg5[%67, %c0_52, %c0_53] : memref<8x8x128xf32, #tpu.memory_space<vmem>>, vector<1x8x128xf32>
      %69 = vector.shape_cast %68 : vector<1x8x128xf32> to vector<8x128xf32>
      %70 = vector.shape_cast %64 : vector<8x128xf32> to vector<1x8x128xf32>
      tpu.vector_store %arg5[%67, %c0_52, %c0_53], %70 {strides = array<i32>} : memref<8x8x128xf32, #tpu.memory_space<vmem>>, vector<1x8x128xf32>,
    }
    %c8_i32_25 = arith.constant 8 : i32
    %c0_26 = arith.constant 0 : index
    %c0_27 = arith.constant 0 : index
    %31 = vector.load %arg10[%c0_26, %c0_27] : memref<8x128xf32, #tpu.memory_space<vmem>>, vector<8x128xf32>
    %c0_28 = arith.constant 0 : index
    %c0_29 = arith.constant 0 : index
    %32 = vector.load %arg6[%c0_28, %c0_29] : memref<8x128xf32, #tpu.memory_space<vmem>>, vector<8x128xf32>
    tpu.vector_store %arg6[%c0_28, %c0_29], %31 {strides = array<i32>} : memref<8x128xf32, #tpu.memory_space<vmem>>, vector<8x128xf32>,
    %c0_30 = arith.constant 0 : index
    %c0_31 = arith.constant 0 : index
    %33 = vector.load %arg11[%c0_30, %c0_31] : memref<8x128xf32, #tpu.memory_space<vmem>>, vector<8x128xf32>
    %c0_32 = arith.constant 0 : index
    %c0_33 = arith.constant 0 : index
    %34 = vector.load %arg7[%c0_32, %c0_33] : memref<8x128xf32, #tpu.memory_space<vmem>>, vector<8x128xf32>
    tpu.vector_store %arg7[%c0_32, %c0_33], %33 {strides = array<i32>} : memref<8x128xf32, #tpu.memory_space<vmem>>, vector<8x128xf32>,
    return
  }
}

</mosaic_0001>

<bundles_post_ra>
// kernel: tpu_custom_call.1
= control target key start
LH: loop header
LB: loop body
LE: loop exit
PB: predicated region body
PF: predicated region fallthrough
CT: control target
= control target key end

     0   :  { %13 = vsyncpa [#allocation7], 0  ;;  %s2141_s0 = inlined_call_operand.hbm [shape: f32[8,8,32], index: 0, kind: input, shape index: {}]   ;;  %s2142_s1 = inlined_call_operand.hbm [shape: f32[32,512], index: 1, kind: input, shape index: {}]   ;;  %s2143_s2 = inlined_call_operand.hbm [shape: f32[128,512], index: 2, kind: input, shape index: {}]   ;;  %s2144_s3 = inlined_call_operand.vmem [shape: f32[1,512], index: 3, kind: input, shape index: {}]   ;;  %s2145_s4 = inlined_call_operand.hbm [shape: f32[128,512], index: 4, kind: input, shape index: {}]   ;;  %s2146_s5 = inlined_call_operand.hbm [shape: f32[8,8,128], index: 5, kind: output, shape index: {0}]   ;;  %s2147_s6 = inlined_call_operand.hbm [shape: f32[8,128], index: 6, kind: output, shape index: {1}]   ;;  %s2148_s7 = inlined_call_operand.hbm [shape: f32[8,128], index: 7, kind: output, shape index: {2}]  }
   0x1   :  { %14 = vsyncpa [#allocation10], 0 }
   0x2   :  { %15 = vsyncpa [#allocation13], 0 }
   0x3   :  { %16 = vsyncpa [#allocation8], 0 }
   0x4   :  { %17 = vsyncpa [#allocation16], 0  ;;  %s1454_s24 = smov [#allocation9]   ;;  %s1282_s28 = scalar_lea.hbm %s2142_s1, 2048 }
   0x5   :  { %s35_s25 = sshll.u32 %s1454_s24, 4  ;;  %p1283_p0 = scmp.ne.s32.totalorder %s2142_s1, %s1282_s28  ;;  %s36_s25 = int_to_ptr.vmem [resolvable:$true] %s35_s25 }
   0x6   :  { %p1286_p1 = scmp.lt.u32.totalorder %s1282_s28, %s2142_s1 }
   0x8   :  { %p1288_p2 = pnand %p1286_p1, %p1283_p0 }
   0xa   :  { %1291 = shalt.err (!%p1288_p2)
}
   0xb   :  { %s1292_s10 = scalar_lea.vmem %s36_s25, 2048  ;;  %p1297_p4 = scmp.lt.s32.totalorder %s36_s25, %s36_s25 }
   0xc   :  { %p1293_p3 = scmp.ne.s32.totalorder %s36_s25, %s1292_s10  ;;  %p1298_p5 = scmp.lt.s32.totalorder %s1292_s10, %s1292_s10 }
   0xe   :  { %p1299_p6 = por %p1298_p5, %p1297_p4 }
  0x10   :  { %p1300_p7 = pnand %p1299_p6, %p1293_p3 }
  0x12   :  { %1303 = shalt.err (!%p1300_p7)
}
  0x13   :  { %s1455_s11 = smov 512   ;;  %s1456_s12 = smov 32  }
  0x14   :  { %41 = dma.hbm_to_vmem [thread:$0]  %s2142_s1, 2048, %s36_s25, [#allocation10], %s1455_s11, %s1455_s11, %s1456_s12  }
  0x15   :  { %s1457_s15 = smov [#allocation6]   ;;  %s1304_s19 = scalar_lea.hbm %s2141_s0, 1024 }
  0x16   :  { %s23_s16 = sshll.u32 %s1457_s15, 4  ;;  %p1305_p8 = scmp.ne.s32.totalorder %s2141_s0, %s1304_s19  ;;  %s24_s16 = int_to_ptr.vmem [resolvable:$true] %s23_s16 }
  0x17   :  { %p1308_p9 = scmp.lt.u32.totalorder %s1304_s19, %s2141_s0 }
  0x19   :  { %p1310_p10 = pnand %p1308_p9, %p1305_p8 }
  0x1b   :  { %1313 = shalt.err (!%p1310_p10)
}
  0x1c   :  { %s1314_s24 = scalar_lea.vmem %s24_s16, 1024  ;;  %p1319_p12 = scmp.lt.s32.totalorder %s24_s16, %s24_s16 }
  0x1d   :  { %p1315_p11 = scmp.ne.s32.totalorder %s24_s16, %s1314_s24  ;;  %p1320_p13 = scmp.lt.s32.totalorder %s1314_s24, %s1314_s24 }
  0x1f   :  { %p1321_p0 = por %p1320_p13, %p1319_p12 }
  0x21   :  { %p1322_p1 = pnand %p1321_p0, %p1315_p11 }
  0x23   :  { %1325 = shalt.err (!%p1322_p1)
}
  0x24   :  { %s1458_s1 = smov 128   ;;  %s1459_s25 = smov 8  }
  0x25   :  { %29 = dma.hbm_to_vmem [thread:$0]  %s2141_s0, 1024, %s24_s16, [#allocation7], %s1458_s1, %s1458_s1, %s1459_s25  }
  0x26   :  { %s1460_s28 = smov [#allocation11]   ;;  %s1461_s30 = smov [#allocation12]  }
  0x27   :  { %s47_s29 = sshll.u32 %s1460_s28, 4  ;;  %s61_s8 = sshll.u32 %s1461_s30, 4  ;;  %s48_s29 = int_to_ptr.vmem [resolvable:$true] %s47_s29  ;;  %s1537_s8 = int_to_ptr.vmem [resolvable:$true] %s61_s8 }
  0x28   :  { %s1326_s13 = scalar_lea.hbm %s2143_s2, 8192 }
  0x29   :  { %p1327_p2 = scmp.ne.s32.totalorder %s2143_s2, %s1326_s13  ;;  %p1330_p3 = scmp.lt.u32.totalorder %s1326_s13, %s2143_s2 }
  0x2b   :  { %p1332_p4 = pnand %p1330_p3, %p1327_p2 }
  0x2d   :  { %1335 = shalt.err (!%p1332_p4)
}
  0x2e   :  { %s1336_s0 = scalar_lea.vmem %s48_s29, 8192  ;;  %p1341_p6 = scmp.lt.s32.totalorder %s48_s29, %s48_s29 }
  0x2f   :  { %p1337_p5 = scmp.ne.s32.totalorder %s48_s29, %s1336_s0  ;;  %p1342_p7 = scmp.lt.s32.totalorder %s1336_s0, %s1336_s0 }
  0x31   :  { %p1343_p8 = por %p1342_p7, %p1341_p6 }
  0x33   :  { %p1344_p9 = pnand %p1343_p8, %p1337_p5 }
  0x35   :  { %1347 = shalt.err (!%p1344_p9)
}
  0x36   :  { %53 = dma.hbm_to_vmem [thread:$0]  %s2143_s2, 8192, %s48_s29, [#allocation10], %s1455_s11, %s1455_s11, %s1456_s12  }
  0x37   :  { %s1348_s22 = scalar_lea.hbm %s2145_s4, 8192 }
  0x38   :  { %p1349_p10 = scmp.ne.s32.totalorder %s2145_s4, %s1348_s22  ;;  %p1352_p11 = scmp.lt.u32.totalorder %s1348_s22, %s2145_s4 }
  0x3a   :  { %p1354_p12 = pnand %p1352_p11, %p1349_p10 }
  0x3c   :  { %1357 = shalt.err (!%p1354_p12)
}
  0x3d   :  { %s1358_s28 = scalar_lea.vmem %s1537_s8, 8192  ;;  %p1363_p0 = scmp.lt.s32.totalorder %s1537_s8, %s1537_s8 }
  0x3e   :  { %p1359_p13 = scmp.ne.s32.totalorder %s1537_s8, %s1358_s28  ;;  %p1364_p1 = scmp.lt.s32.totalorder %s1358_s28, %s1358_s28 }
  0x40   :  { %p1365_p2 = por %p1364_p1, %p1363_p0 }
  0x42   :  { %p1366_p3 = pnand %p1365_p2, %p1359_p13 }
  0x44   :  { %1369 = shalt.err (!%p1366_p3)
}
  0x45   :  { %67 = dma.hbm_to_vmem [thread:$0]  %s2145_s4, 8192, %s1537_s8, [#allocation13], %s1455_s11, %s1455_s11, %s1456_s12  }
  0x46   :  { %1440 = dma.done.wait [#allocation7], 1024  }
  0x47   :  { %1441 = vsyncadd [#allocation7], 4294966272 }
  0x48   :  { %1442 = dma.done.wait [#allocation10], 10240  }
  0x49   :  { %1443 = vsyncadd [#allocation10], 4294957056 }
  0x4a   :  { %1444 = dma.done.wait [#allocation13], 8192  }
  0x4b   :  { %1445 = vsyncadd [#allocation13], 4294959104  ;;  %v2149_v0 = vmov 0.0   ;;  %v80_v1 = vld [vmem:[#allocation12] sm:$0xff]  ;;  %v81_v2 = vld [vmem:[#allocation12 + $0x8] sm:$0xff] }
  0x4c   :  { %599 = vmatprep.mubr.f32.mxu0 %v2149_v0  ;;  %793 = vst [vmem:[#allocation4] sm:$0xff] %v2149_v0  ;;  %794 = vst [vmem:[#allocation5] sm:$0xff] %v2149_v0  ;;  %712 = vmatprep.mubr.f32.mxu1 %v2149_v0  ;;  %v82_v3 = vld [vmem:[#allocation12 + $0x10] sm:$0xff]  ;;  %v83_v4 = vld [vmem:[#allocation12 + $0x18] sm:$0xff]  ;;  %vm144_vm0 = vcmp.ge.f32.partialorder %v80_v1, 0.25  ;;  %vm145_vm1 = vcmp.ge.f32.partialorder %v81_v2, 0.25 }
  0x4d   :  { %v84_v5 = vld [vmem:[#allocation12 + $0x20] sm:$0xff]  ;;  %v209_v7 = vld [vmem:[#allocation11 + $0x8] sm:$0xff]  ;;  %v210_v9 = vld [vmem:[#allocation11 + $0x10] sm:$0xff]  ;;  %vm146_vm2 = vcmp.ge.f32.partialorder %v82_v3, 0.25  ;;  %vm147_vm3 = vcmp.ge.f32.partialorder %v83_v4, 0.25 }
  0x4e   :  { %v208_v6 = vld [vmem:[#allocation11] sm:$0xff]  ;;  %v85_v8 = vld [vmem:[#allocation12 + $0x28] sm:$0xff]  ;;  %v211_v10 = vld [vmem:[#allocation11 + $0x18] sm:$0xff]  ;;  %v273_v15 = vmul.f32 1.3333334, %v209_v7  ;;  %vm148_vm4 = vcmp.ge.f32.partialorder %v84_v5, 0.25 }
  0x4f   :  { %v272_v11 = vmul.f32 1.3333334, %v208_v6  ;;  %v86_v12 = vld [vmem:[#allocation12 + $0x30] sm:$0xff]  ;;  %v87_v13 = vld [vmem:[#allocation12 + $0x38] sm:$0xff]  ;;  %v212_v14 = vld [vmem:[#allocation11 + $0x20] sm:$0xff]  ;;  %vm149_vm5 = vcmp.ge.f32.partialorder %v85_v8, 0.25 }
  0x50   :  { %v88_v16 = vld [vmem:[#allocation12 + $0x40] sm:$0xff]  ;;  %v213_v17 = vld [vmem:[#allocation11 + $0x28] sm:$0xff]  ;;  %v274_v18 = vmul.f32 1.3333334, %v210_v9  ;;  %v214_v20 = vld [vmem:[#allocation11 + $0x30] sm:$0xff]  ;;  %v337_v22 = vsel %vm145_vm1, %v273_v15, 0.0 }
  0x51   :  { %v336_v19 = vsel %vm144_vm0, %v272_v11, 0.0  ;;  %v275_v21 = vmul.f32 1.3333334, %v211_v10  ;;  %v89_v23 = vld [vmem:[#allocation12 + $0x48] sm:$0xff]  ;;  %v90_v24 = vld [vmem:[#allocation12 + $0x50] sm:$0xff]  ;;  %v215_v25 = vld [vmem:[#allocation11 + $0x38] sm:$0xff] }
  0x52   :  { %400 = vst [vmem:[#allocation2] sm:$0xff] %v336_v19  ;;  %v276_v26 = vmul.f32 1.3333334, %v212_v14  ;;  %v338_v27 = vsel %vm146_vm2, %v274_v18, 0.0  ;;  %401 = vst [vmem:[#allocation2 + $0x8] sm:$0xff] %v337_v22  ;;  %v91_v28 = vld [vmem:[#allocation12 + $0x58] sm:$0xff] }
  0x53   :  { %vm150_vm6 = vcmp.ge.f32.partialorder %v86_v12, 0.25  ;;  %v216_v29 = vld [vmem:[#allocation11 + $0x40] sm:$0xff]  ;;  %v277_v30 = vmul.f32 1.3333334, %v213_v17  ;;  %v339_v31 = vsel %vm147_vm3, %v275_v21, 0.0  ;;  %402 = vst [vmem:[#allocation2 + $0x10] sm:$0xff] %v338_v27 }
  0x54   :  { %vm151_vm7 = vcmp.ge.f32.partialorder %v87_v13, 0.25  ;;  %vm152_vm8 = vcmp.ge.f32.partialorder %v88_v16, 0.25  ;;  %v217_v32 = vld [vmem:[#allocation11 + $0x48] sm:$0xff]  ;;  %v278_v33 = vmul.f32 1.3333334, %v214_v20  ;;  %v340_v34 = vsel %vm148_vm4, %v276_v26, 0.0 }
  0x55   :  { %403 = vst [vmem:[#allocation2 + $0x18] sm:$0xff] %v339_v31  ;;  %v92_v35 = vld [vmem:[#allocation12 + $0x60] sm:$0xff]  ;;  %v93_v36 = vld [vmem:[#allocation12 + $0x68] sm:$0xff]  ;;  %v218_v37 = vld [vmem:[#allocation11 + $0x50] sm:$0xff]  ;;  %v279_v38 = vmul.f32 1.3333334, %v215_v25 }
  0x56   :  { %v341_v39 = vsel %vm149_vm5, %v277_v30, 0.0  ;;  %404 = vst [vmem:[#allocation2 + $0x20] sm:$0xff] %v340_v34  ;;  %v94_v40 = vld [vmem:[#allocation12 + $0x70] sm:$0xff]  ;;  %vm153_vm9 = vcmp.ge.f32.partialorder %v89_v23, 0.25  ;;  %v219_v41 = vld [vmem:[#allocation11 + $0x58] sm:$0xff]  ;;  %v342_v43 = vsel %vm150_vm6, %v278_v33, 0.0 }
  0x57   :  { %v280_v42 = vmul.f32 1.3333334, %v216_v29  ;;  %405 = vst [vmem:[#allocation2 + $0x28] sm:$0xff] %v341_v39  ;;  %vm154_vm10 = vcmp.ge.f32.partialorder %v90_v24, 0.25  ;;  %vm155_vm11 = vcmp.ge.f32.partialorder %v91_v28, 0.25  ;;  %v220_v44 = vld [vmem:[#allocation11 + $0x60] sm:$0xff] }
  0x58   :  { %v281_v45 = vmul.f32 1.3333334, %v217_v32  ;;  %v343_v46 = vsel %vm151_vm7, %v279_v38, 0.0  ;;  %406 = vst [vmem:[#allocation2 + $0x30] sm:$0xff] %v342_v43  ;;  %v95_v47 = vld [vmem:[#allocation12 + $0x78] sm:$0xff]  ;;  %v96_v48 = vld [vmem:[#allocation12 + $0x80] sm:$0xff] }
  0x59   :  { %v221_v49 = vld [vmem:[#allocation11 + $0x68] sm:$0xff]  ;;  %v282_v50 = vmul.f32 1.3333334, %v218_v37  ;;  %v344_v51 = vsel %vm152_vm8, %v280_v42, 0.0  ;;  %407 = vst [vmem:[#allocation2 + $0x38] sm:$0xff] %v343_v46  ;;  %vm156_vm12 = vcmp.ge.f32.partialorder %v92_v35, 0.25 }
  0x5a   :  { %v97_v52 = vld [vmem:[#allocation12 + $0x88] sm:$0xff]  ;;  %v222_v53 = vld [vmem:[#allocation11 + $0x70] sm:$0xff]  ;;  %v283_v54 = vmul.f32 1.3333334, %v219_v41  ;;  %v345_v55 = vsel %vm153_vm9, %v281_v45, 0.0  ;;  %408 = vst [vmem:[#allocation2 + $0x40] sm:$0xff] %v344_v51 }
  0x5b   :  { %vm157_vm13 = vcmp.ge.f32.partialorder %v93_v36, 0.25  ;;  %vm158_vm14 = vcmp.ge.f32.partialorder %v94_v40, 0.25  ;;  %v223_v56 = vld [vmem:[#allocation11 + $0x78] sm:$0xff]  ;;  %v284_v57 = vmul.f32 1.3333334, %v220_v44  ;;  %v346_v58 = vsel %vm154_vm10, %v282_v50, 0.0 }
  0x5c   :  { %409 = vst [vmem:[#allocation2 + $0x48] sm:$0xff] %v345_v55  ;;  %vm159_vm15 = vcmp.ge.f32.partialorder %v95_v47, 0.25  ;;  %vm160_vm0 = vcmp.ge.f32.partialorder %v96_v48, 0.25  ;;  %v224_v59 = vld [vmem:[#allocation11 + $0x80] sm:$0xff]  ;;  %v285_v60 = vmul.f32 1.3333334, %v221_v49 }
  0x5d   :  { %v347_v61 = vsel %vm155_vm11, %v283_v54, 0.0  ;;  %410 = vst [vmem:[#allocation2 + $0x50] sm:$0xff] %v346_v58  ;;  %vm161_vm1 = vcmp.ge.f32.partialorder %v97_v52, 0.25  ;;  %v225_v62 = vld [vmem:[#allocation11 + $0x88] sm:$0xff]  ;;  %v226_v63 = vld [vmem:[#allocation11 + $0x90] sm:$0xff]  ;;  %v348_v2 = vsel %vm156_vm12, %v284_v57, 0.0 }
  0x5e   :  { %v286_v1 = vmul.f32 1.3333334, %v222_v53  ;;  %411 = vst [vmem:[#allocation2 + $0x58] sm:$0xff] %v347_v61  ;;  %v227_v3 = vld [vmem:[#allocation11 + $0x98] sm:$0xff]  ;;  %v228_v4 = vld [vmem:[#allocation11 + $0xa0] sm:$0xff]  ;;  %v229_v5 = vld [vmem:[#allocation11 + $0xa8] sm:$0xff] }
  0x5f   :  { %v287_v6 = vmul.f32 1.3333334, %v223_v56  ;;  %v349_v7 = vsel %vm157_vm13, %v285_v60, 0.0  ;;  %412 = vst [vmem:[#allocation2 + $0x60] sm:$0xff] %v348_v2  ;;  %v230_v8 = vld [vmem:[#allocation11 + $0xb0] sm:$0xff]  ;;  %v231_v9 = vld [vmem:[#allocation11 + $0xb8] sm:$0xff] }
  0x60   :  { %v232_v10 = vld [vmem:[#allocation11 + $0xc0] sm:$0xff]  ;;  %v288_v11 = vmul.f32 1.3333334, %v224_v59  ;;  %v350_v12 = vsel %vm158_vm14, %v286_v1, 0.0  ;;  %413 = vst [vmem:[#allocation2 + $0x68] sm:$0xff] %v349_v7  ;;  %v233_v13 = vld [vmem:[#allocation11 + $0xc8] sm:$0xff] }
  0x61   :  { %v234_v14 = vld [vmem:[#allocation11 + $0xd0] sm:$0xff]  ;;  %v235_v15 = vld [vmem:[#allocation11 + $0xd8] sm:$0xff]  ;;  %v289_v16 = vmul.f32 1.3333334, %v225_v62  ;;  %v351_v17 = vsel %vm159_vm15, %v287_v6, 0.0  ;;  %414 = vst [vmem:[#allocation2 + $0x70] sm:$0xff] %v350_v12 }
  0x62   :  { %v236_v18 = vld [vmem:[#allocation11 + $0xe0] sm:$0xff]  ;;  %v237_v19 = vld [vmem:[#allocation11 + $0xe8] sm:$0xff]  ;;  %v238_v20 = vld [vmem:[#allocation11 + $0xf0] sm:$0xff]  ;;  %v352_v21 = vsel %vm160_vm0, %v288_v11, 0.0  ;;  %415 = vst [vmem:[#allocation2 + $0x78] sm:$0xff] %v351_v17 }
  0x63   :  { %v1595_v22 = vld [vmem:[#allocation12 + $0x90] sm:$0xff]  ;;  %v1597_v23 = vld [vmem:[#allocation12 + $0x98] sm:$0xff]  ;;  %v1599_v24 = vld [vmem:[#allocation12 + $0xa0] sm:$0xff]  ;;  %v1603_v29 = vmul.f32 1.3333334, %v226_v63  ;;  %v353_v30 = vsel %vm161_vm1, %v289_v16, 0.0 }
  0x64   :  { %v1601_v25 = vld [vmem:[#allocation12 + $0xa8] sm:$0xff]  ;;  %v239_v26 = vld [vmem:[#allocation11 + $0xf8] sm:$0xff]  ;;  %v240_v27 = vld [vmem:[#allocation11 + $0x100] sm:$0xff]  ;;  %416 = vst [vmem:[#allocation2 + $0x80] sm:$0xff] %v352_v21  ;;  %v1614_v38 = vmul.f32 1.3333334, %v227_v3 }
  0x65   :  { %v241_v28 = vld [vmem:[#allocation11 + $0x108] sm:$0xff]  ;;  %v1606_v31 = vld [vmem:[#allocation12 + $0xb0] sm:$0xff]  ;;  %v1608_v32 = vld [vmem:[#allocation12 + $0xb8] sm:$0xff]  ;;  %v1616_v39 = vmul.f32 1.3333334, %v228_v4  ;;  %417 = vst [vmem:[#allocation2 + $0x88] sm:$0xff] %v353_v30 }
  0x66   :  { %v1610_v33 = vld [vmem:[#allocation12 + $0xc0] sm:$0xff]  ;;  %v1612_v34 = vld [vmem:[#allocation12 + $0xc8] sm:$0xff]  ;;  %v242_v35 = vld [vmem:[#allocation11 + $0x110] sm:$0xff]  ;;  %v1618_v40 = vmul.f32 1.3333334, %v229_v5  ;;  %vm162_vm2 = vcmp.ge.f32.partialorder %v1595_v22, 0.25 }
  0x67   :  { %v243_v36 = vld [vmem:[#allocation11 + $0x118] sm:$0xff]  ;;  %v244_v37 = vld [vmem:[#allocation11 + $0x120] sm:$0xff]  ;;  %v1620_v41 = vld [vmem:[#allocation12 + $0xd0] sm:$0xff]  ;;  %v1634_v48 = vmul.f32 1.3333334, %v230_v8  ;;  %vm163_vm3 = vcmp.ge.f32.partialorder %v1597_v23, 0.25 }
  0x68   :  { %v1622_v42 = vld [vmem:[#allocation12 + $0xd8] sm:$0xff]  ;;  %v1624_v43 = vld [vmem:[#allocation12 + $0xe0] sm:$0xff]  ;;  %v1626_v44 = vld [vmem:[#allocation12 + $0xe8] sm:$0xff]  ;;  %v1636_v49 = vmul.f32 1.3333334, %v231_v9  ;;  %vm164_vm4 = vcmp.ge.f32.partialorder %v1599_v24, 0.25 }
  0x69   :  { %2163 = vst [vmem:[#allocation23_spill] sm:$0xff] %v1622_v42  ;;  %2164 = vst [vmem:[#allocation24_spill] sm:$0xff] %v1624_v43  ;;  %v1628_v45 = vld [vmem:[#allocation11 + $0x128] sm:$0xff]  ;;  %v1630_v46 = vld [vmem:[#allocation11 + $0x130] sm:$0xff]  ;;  %v1638_v50 = vmul.f32 1.3333334, %v232_v10 }
  0x6a   :  { %2165 = vst [vmem:[#allocation25_spill] sm:$0xff] %v1626_v44  ;;  %v1632_v47 = vld [vmem:[#allocation11 + $0x138] sm:$0xff]  ;;  %v1640_v51 = vld [vmem:[#allocation12 + $0xf0] sm:$0xff]  ;;  %v1644_v53 = vld [vmem:[#allocation12 + $0x100] sm:$0xff]  ;;  %v1654_v58 = vmul.f32 1.3333334, %v233_v13 }
  0x6b   :  { %2166 = vst [vmem:[#allocation26_spill] sm:$0xff] %v1640_v51  ;;  %v1642_v52 = vld [vmem:[#allocation12 + $0xf8] sm:$0xff]  ;;  %2168 = vst [vmem:[#allocation28_spill] sm:$0xff] %v1644_v53  ;;  %v1646_v54 = vld [vmem:[#allocation12 + $0x108] sm:$0xff]  ;;  %v1656_v59 = vmul.f32 1.3333334, %v234_v14 }
  0x6c   :  { %2167 = vst [vmem:[#allocation27_spill] sm:$0xff] %v1642_v52  ;;  %2169 = vst [vmem:[#allocation29_spill] sm:$0xff] %v1646_v54  ;;  %v1648_v55 = vld [vmem:[#allocation11 + $0x140] sm:$0xff]  ;;  %v1650_v56 = vld [vmem:[#allocation11 + $0x148] sm:$0xff]  ;;  %v1658_v60 = vmul.f32 1.3333334, %v235_v15 }
  0x6d   :  { %v1652_v57 = vld [vmem:[#allocation11 + $0x150] sm:$0xff]  ;;  %v1662_v62 = vld [vmem:[#allocation12 + $0x118] sm:$0xff]  ;;  %v1664_v63 = vld [vmem:[#allocation12 + $0x120] sm:$0xff]  ;;  %v1674_v5 = vmul.f32 1.3333334, %v236_v18  ;;  %vm165_vm5 = vcmp.ge.f32.partialorder %v1601_v25, 0.25 }
  0x6e   :  { %2170 = vst [vmem:[#allocation30_spill] sm:$0xff] %v1658_v60  ;;  %v1660_v61 = vld [vmem:[#allocation12 + $0x110] sm:$0xff]  ;;  %2172 = vst [vmem:[#allocation32_spill] sm:$0xff] %v1662_v62  ;;  %v1666_v1 = vld [vmem:[#allocation12 + $0x128] sm:$0xff]  ;;  %v1676_v6 = vmul.f32 1.3333334, %v237_v19 }
  0x6f   :  { %2171 = vst [vmem:[#allocation31_spill] sm:$0xff] %v1660_v61  ;;  %2173 = vst [vmem:[#allocation33_spill] sm:$0xff] %v1664_v63  ;;  %v1668_v2 = vld [vmem:[#allocation11 + $0x158] sm:$0xff]  ;;  %v1670_v3 = vld [vmem:[#allocation11 + $0x160] sm:$0xff]  ;;  %v1678_v7 = vmul.f32 1.3333334, %v238_v20 }
  0x70   :  { %2174 = vst [vmem:[#allocation34_spill] sm:$0xff] %v1666_v1  ;;  %v1672_v4 = vld [vmem:[#allocation11 + $0x168] sm:$0xff]  ;;  %2175 = vst [vmem:[#allocation35_spill] sm:$0xff] %v1674_v5  ;;  %v1680_v8 = vld [vmem:[#allocation12 + $0x130] sm:$0xff]  ;;  %v1698_v15 = vmul.f32 1.3333334, %v239_v26 }
  0x71   :  { %2176 = vst [vmem:[#allocation36_spill] sm:$0xff] %v1676_v6  ;;  %2177 = vst [vmem:[#allocation37_spill] sm:$0xff] %v1678_v7  ;;  %v1682_v9 = vld [vmem:[#allocation12 + $0x138] sm:$0xff]  ;;  %v1684_v10 = vld [vmem:[#allocation12 + $0x140] sm:$0xff]  ;;  %v1700_v16 = vmul.f32 1.3333334, %v240_v27 }
  0x72   :  { %2178 = vst [vmem:[#allocation38_spill] sm:$0xff] %v1680_v8  ;;  %v1686_v11 = vld [vmem:[#allocation12 + $0x148] sm:$0xff]  ;;  %v1692_v12 = vld [vmem:[#allocation11 + $0x170] sm:$0xff]  ;;  %v1694_v13 = vld [vmem:[#allocation11 + $0x178] sm:$0xff]  ;;  %v1702_v17 = vmul.f32 1.3333334, %v241_v28 }
  0x73   :  { %v1696_v14 = vld [vmem:[#allocation11 + $0x180] sm:$0xff]  ;;  %2179 = vst [vmem:[#allocation39_spill] sm:$0xff] %v1698_v15  ;;  %2180 = vst [vmem:[#allocation40_spill] sm:$0xff] %v1700_v16  ;;  %v1704_v18 = vld [vmem:[#allocation12 + $0x150] sm:$0xff]  ;;  %vm166_vm6 = vcmp.ge.f32.partialorder %v1606_v31, 0.25  ;;  %vm167_vm7 = vcmp.ge.f32.partialorder %v1608_v32, 0.25 }
  0x74   :  { %2181 = vst [vmem:[#allocation41_spill] sm:$0xff] %v1702_v17  ;;  %v1706_v19 = vld [vmem:[#allocation12 + $0x158] sm:$0xff]  ;;  %v1708_v20 = vld [vmem:[#allocation12 + $0x160] sm:$0xff]  ;;  %v1710_v21 = vld [vmem:[#allocation12 + $0x168] sm:$0xff]  ;;  %vm168_vm8 = vcmp.ge.f32.partialorder %v1610_v33, 0.25  ;;  %vm169_vm9 = vcmp.ge.f32.partialorder %v1612_v34, 0.25 }
  0x75   :  { %v1716_v26 = vld [vmem:[#allocation11 + $0x188] sm:$0xff]  ;;  %v1718_v27 = vld [vmem:[#allocation11 + $0x190] sm:$0xff]  ;;  %v1720_v28 = vld [vmem:[#allocation11 + $0x198] sm:$0xff]  ;;  %v1722_v30 = vmul.f32 1.3333334, %v242_v35  ;;  %vm170_vm10 = vcmp.ge.f32.partialorder %v1620_v41, 0.25 }
  0x76   :  { %v1724_v0 = vmul.f32 1.3333334, %v243_v36  ;;  %v1726_v17 = vmul.f32 1.3333334, %v244_v37  ;;  %v1728_v16 = vld [vmem:[#allocation12 + $0x170] sm:$0xff]  ;;  %v1730_v15 = vld [vmem:[#allocation12 + $0x178] sm:$0xff] }
  0x77   :  { %2182 = vst [vmem:[#allocation42_spill] sm:$0xff] %v1722_v30  ;;  %v1732_v7 = vld [vmem:[#allocation12 + $0x180] sm:$0xff]  ;;  %v1734_v6 = vld [vmem:[#allocation12 + $0x188] sm:$0xff]  ;;  %v262_v37 = vld [vmem:[#allocation11 + $0x1b0] sm:$0xff]  ;;  %v1747_v30 = vmul.f32 1.3333334, %v1632_v47 }
  0x78   :  { %2183 = vst [vmem:[#allocation43_spill] sm:$0xff] %v1724_v0  ;;  %2184 = vst [vmem:[#allocation44_spill] sm:$0xff] %v1726_v17  ;;  %v260_v35 = vld [vmem:[#allocation11 + $0x1a0] sm:$0xff]  ;;  %v261_v36 = vld [vmem:[#allocation11 + $0x1a8] sm:$0xff]  ;;  %v1741_v17 = vmul.f32 1.3333334, %v1628_v45 }
  0x79   :  { %v1744_v0 = vmul.f32 1.3333334, %v1630_v46  ;;  %2187 = vst [vmem:[#allocation47_spill] sm:$0xff] %v1747_v30  ;;  %v1749_v5 = vld [vmem:[#allocation12 + $0x190] sm:$0xff]  ;;  %v1751_v60 = vld [vmem:[#allocation12 + $0x198] sm:$0xff]  ;;  %v1753_v42 = vld [vmem:[#allocation12 + $0x1a0] sm:$0xff] }
  0x7a   :  { %2185 = vst [vmem:[#allocation45_spill] sm:$0xff] %v1741_v17  ;;  %v1755_v43 = vld [vmem:[#allocation12 + $0x1a8] sm:$0xff]  ;;  %v263_v45 = vld [vmem:[#allocation11 + $0x1b8] sm:$0xff]  ;;  %v264_v46 = vld [vmem:[#allocation11 + $0x1c0] sm:$0xff]  ;;  %v1762_v30 = vmul.f32 1.3333334, %v1648_v55 }
  0x7b   :  { %2186 = vst [vmem:[#allocation46_spill] sm:$0xff] %v1744_v0  ;;  %v265_v47 = vld [vmem:[#allocation11 + $0x1c8] sm:$0xff]  ;;  %v1765_v0 = vmul.f32 1.3333334, %v1650_v56  ;;  %v1768_v17 = vmul.f32 1.3333334, %v1652_v57 }
  0x7c   :  { %2188 = vst [vmem:[#allocation48_spill] sm:$0xff] %v1762_v30  ;;  %v1770_v44 = vld [vmem:[#allocation12 + $0x1b0] sm:$0xff]  ;;  %v1772_v51 = vld [vmem:[#allocation12 + $0x1b8] sm:$0xff]  ;;  %v1774_v52 = vld [vmem:[#allocation12 + $0x1c0] sm:$0xff]  ;;  %v1789_v30 = vmul.f32 1.3333334, %v1672_v4 }
  0x7d   :  { %2189 = vst [vmem:[#allocation49_spill] sm:$0xff] %v1765_v0  ;;  %2190 = vst [vmem:[#allocation50_spill] sm:$0xff] %v1768_v17  ;;  %v1776_v53 = vld [vmem:[#allocation12 + $0x1c8] sm:$0xff]  ;;  %v266_v55 = vld [vmem:[#allocation11 + $0x1d0] sm:$0xff]  ;;  %v1783_v17 = vmul.f32 1.3333334, %v1668_v2 }
  0x7e   :  { %v267_v56 = vld [vmem:[#allocation11 + $0x1d8] sm:$0xff]  ;;  %v268_v57 = vld [vmem:[#allocation11 + $0x1e0] sm:$0xff]  ;;  %v1786_v0 = vmul.f32 1.3333334, %v1670_v3  ;;  %2193 = vst [vmem:[#allocation53_spill] sm:$0xff] %v1789_v30  ;;  %v1791_v54 = vld [vmem:[#allocation12 + $0x1d0] sm:$0xff] }
  0x7f   :  { %2191 = vst [vmem:[#allocation51_spill] sm:$0xff] %v1783_v17  ;;  %v1793_v61 = vld [vmem:[#allocation12 + $0x1d8] sm:$0xff]  ;;  %v1795_v62 = vld [vmem:[#allocation12 + $0x1e0] sm:$0xff]  ;;  %v1797_v63 = vld [vmem:[#allocation12 + $0x1e8] sm:$0xff]  ;;  %v1804_v30 = vmul.f32 1.3333334, %v1692_v12 }
  0x80   :  { %2192 = vst [vmem:[#allocation52_spill] sm:$0xff] %v1786_v0  ;;  %v269_v2 = vld [vmem:[#allocation11 + $0x1e8] sm:$0xff]  ;;  %v270_v3 = vld [vmem:[#allocation11 + $0x1f0] sm:$0xff]  ;;  %v271_v4 = vld [vmem:[#allocation11 + $0x1f8] sm:$0xff]  ;;  %v1807_v0 = vmul.f32 1.3333334, %v1694_v13 }
  0x81   :  { %v1810_v17 = vmul.f32 1.3333334, %v1696_v14  ;;  %v1812_v1 = vld [vmem:[#allocation12 + $0x1f0] sm:$0xff]  ;;  %v1814_v8 = vld [vmem:[#allocation12 + $0x1f8] sm:$0xff]  ;;  %v1821_v12 = vmul.f32 1.3333334, %v1716_v26 }
  0x82   :  { %2194 = vst [vmem:[#allocation54_spill] sm:$0xff] %v1807_v0  ;;  %v1824_v13 = vmul.f32 1.3333334, %v1718_v27  ;;  %v1827_v14 = vmul.f32 1.3333334, %v1720_v28  ;;  %vm199_vm0 = vcmp.ge.f32.partialorder %v1772_v51, 0.25 }
  0x83   :  { %2195 = vst [vmem:[#allocation55_spill] sm:$0xff] %v1810_v17  ;;  %v1833_v17 = vmul.f32 1.3333334, %v260_v35  ;;  %v1835_v0 = vmul.f32 1.3333334, %v261_v36  ;;  %vm202_vm13 = vcmp.ge.f32.partialorder %v1791_v54, 0.25 }
  0x84   :  { %2196 = vst [vmem:[#allocation56_spill] sm:$0xff] %v1827_v14  ;;  %v1837_v26 = vmul.f32 1.3333334, %v262_v37  ;;  %v1843_v27 = vmul.f32 1.3333334, %v263_v45  ;;  %vm203_vm11 = vcmp.ge.f32.partialorder %v1793_v61, 0.25 }
  0x85   :  { %v1845_v28 = vmul.f32 1.3333334, %v264_v46  ;;  %v1847_v14 = vmul.f32 1.3333334, %v265_v47  ;;  %v1853_v35 = vmul.f32 1.3333334, %v266_v55 }
  0x86   :  { %v1855_v36 = vmul.f32 1.3333334, %v267_v56  ;;  %v1857_v37 = vmul.f32 1.3333334, %v268_v57  ;;  %vm204_vm15 = vcmp.ge.f32.partialorder %v1795_v62, 0.25  ;;  %vm205_vm1 = vcmp.ge.f32.partialorder %v1797_v63, 0.25 }
  0x87   :  { %v1863_v45 = vmul.f32 1.3333334, %v269_v2  ;;  %v1865_v46 = vmul.f32 1.3333334, %v270_v3  ;;  %v1867_v47 = vmul.f32 1.3333334, %v271_v4 }
  0x88   :  { %vm206_vm14 = vcmp.ge.f32.partialorder %v1812_v1, 0.25  ;;  %vm207_vm12 = vcmp.ge.f32.partialorder %v1814_v8, 0.25  ;;  %v354_v55 = vsel %vm162_vm2, %v1603_v29, 0.0  ;;  %v355_v56 = vsel %vm163_vm3, %v1614_v38, 0.0  ;;  %v2197_v29 = vld [vmem:[#allocation30_spill] sm:$0xff]  ;;  %v2198_v31 = vld [vmem:[#allocation23_spill] sm:$0xff] }
  0x89   :  { %v356_v57 = vsel %vm164_vm4, %v1616_v39, 0.0  ;;  %v357_v2 = vsel %vm165_vm5, %v1618_v40, 0.0  ;;  %v358_v3 = vsel %vm166_vm6, %v1634_v48, 0.0  ;;  %v359_v22 = vsel %vm167_vm7, %v1636_v49, 0.0  ;;  %418 = vst [vmem:[#allocation2 + $0x90] sm:$0xff] %v354_v55  ;;  %419 = vst [vmem:[#allocation2 + $0x98] sm:$0xff] %v355_v56 }
  0x8a   :  { %v360_v23 = vsel %vm168_vm8, %v1638_v50, 0.0  ;;  %v361_v24 = vsel %vm169_vm9, %v1654_v58, 0.0  ;;  %420 = vst [vmem:[#allocation2 + $0xa0] sm:$0xff] %v356_v57  ;;  %421 = vst [vmem:[#allocation2 + $0xa8] sm:$0xff] %v357_v2  ;;  %v362_v25 = vsel %vm170_vm10, %v1656_v59, 0.0  ;;  %vm2199_vm2 = vcmp.ge.f32.partialorder %v2198_v31, 0.25 }
  0x8b   :  { %v363_v32 = vsel %vm2199_vm2, %v2197_v29, 0.0  ;;  %v2200_v38 = vld [vmem:[#allocation35_spill] sm:$0xff]  ;;  %v2201_v39 = vld [vmem:[#allocation24_spill] sm:$0xff]  ;;  %v2204_v48 = vld [vmem:[#allocation25_spill] sm:$0xff]  ;;  %422 = vst [vmem:[#allocation2 + $0xb0] sm:$0xff] %v358_v3  ;;  %v395_v51 = vsel %vm203_vm11, %v1855_v36, 0.0 }
  0x8c   :  { %vm2202_vm3 = vcmp.ge.f32.partialorder %v2201_v39, 0.25  ;;  %v2203_v40 = vld [vmem:[#allocation36_spill] sm:$0xff]  ;;  %vm2205_vm4 = vcmp.ge.f32.partialorder %v2204_v48, 0.25  ;;  %423 = vst [vmem:[#allocation2 + $0xb8] sm:$0xff] %v359_v22  ;;  %424 = vst [vmem:[#allocation2 + $0xc0] sm:$0xff] %v360_v23  ;;  %v2206_v49 = vld [vmem:[#allocation37_spill] sm:$0xff] }
  0x8d   :  { %v364_v33 = vsel %vm2202_vm3, %v2200_v38, 0.0  ;;  %v365_v34 = vsel %vm2205_vm4, %v2203_v40, 0.0  ;;  %425 = vst [vmem:[#allocation2 + $0xc8] sm:$0xff] %v361_v24  ;;  %v2207_v50 = vld [vmem:[#allocation26_spill] sm:$0xff]  ;;  %v2209_v58 = vld [vmem:[#allocation39_spill] sm:$0xff]  ;;  %v2212_v55 = vld [vmem:[#allocation40_spill] sm:$0xff] }
  0x8e   :  { %vm2208_vm5 = vcmp.ge.f32.partialorder %v2207_v50, 0.25  ;;  %v2210_v59 = vld [vmem:[#allocation27_spill] sm:$0xff]  ;;  %v2213_v56 = vld [vmem:[#allocation28_spill] sm:$0xff]  ;;  %v2215_v2 = vld [vmem:[#allocation41_spill] sm:$0xff]  ;;  %426 = vst [vmem:[#allocation2 + $0xd0] sm:$0xff] %v362_v25  ;;  %v398_v54 = vsel %vm206_vm14, %v1865_v46, 0.0 }
  0x8f   :  { %v366_v41 = vsel %vm2208_vm5, %v2206_v49, 0.0  ;;  %vm2211_vm6 = vcmp.ge.f32.partialorder %v2210_v59, 0.25  ;;  %vm2214_vm7 = vcmp.ge.f32.partialorder %v2213_v56, 0.25  ;;  %v2216_v29 = vld [vmem:[#allocation29_spill] sm:$0xff]  ;;  %427 = vst [vmem:[#allocation2 + $0xd8] sm:$0xff] %v363_v32  ;;  %428 = vst [vmem:[#allocation2 + $0xe0] sm:$0xff] %v364_v33 }
  0x90   :  { %v367_v4 = vsel %vm2211_vm6, %v2209_v58, 0.0  ;;  %v368_v57 = vsel %vm2214_vm7, %v2212_v55, 0.0  ;;  %vm2217_vm8 = vcmp.ge.f32.partialorder %v2216_v29, 0.25  ;;  %429 = vst [vmem:[#allocation2 + $0xe8] sm:$0xff] %v365_v34  ;;  %v2218_v3 = vld [vmem:[#allocation42_spill] sm:$0xff]  ;;  %v2219_v22 = vld [vmem:[#allocation31_spill] sm:$0xff] }
  0x91   :  { %v369_v31 = vsel %vm2217_vm8, %v2215_v2, 0.0  ;;  %vm2220_vm9 = vcmp.ge.f32.partialorder %v2219_v22, 0.25  ;;  %v2221_v24 = vld [vmem:[#allocation43_spill] sm:$0xff]  ;;  %v2222_v38 = vld [vmem:[#allocation32_spill] sm:$0xff]  ;;  %v2225_v48 = vld [vmem:[#allocation33_spill] sm:$0xff]  ;;  %430 = vst [vmem:[#allocation2 + $0xf0] sm:$0xff] %v366_v41 }
  0x92   :  { %v370_v23 = vsel %vm2220_vm9, %v2218_v3, 0.0  ;;  %vm2223_vm10 = vcmp.ge.f32.partialorder %v2222_v38, 0.25  ;;  %v2224_v40 = vld [vmem:[#allocation44_spill] sm:$0xff]  ;;  %vm2226_vm2 = vcmp.ge.f32.partialorder %v2225_v48, 0.25  ;;  %v2227_v50 = vld [vmem:[#allocation45_spill] sm:$0xff]  ;;  %v2228_v58 = vld [vmem:[#allocation34_spill] sm:$0xff] }
  0x93   :  { %v371_v39 = vsel %vm2223_vm10, %v2221_v24, 0.0  ;;  %v372_v49 = vsel %vm2226_vm2, %v2224_v40, 0.0  ;;  %vm2229_vm3 = vcmp.ge.f32.partialorder %v2228_v58, 0.25  ;;  %431 = vst [vmem:[#allocation2 + $0xf8] sm:$0xff] %v367_v4  ;;  %432 = vst [vmem:[#allocation2 + $0x100] sm:$0xff] %v368_v57  ;;  %v2230_v25 = vld [vmem:[#allocation46_spill] sm:$0xff] }
  0x94   :  { %v373_v59 = vsel %vm2229_vm3, %v2227_v50, 0.0  ;;  %433 = vst [vmem:[#allocation2 + $0x108] sm:$0xff] %v369_v31  ;;  %v2231_v32 = vld [vmem:[#allocation38_spill] sm:$0xff]  ;;  %v2233_v34 = vld [vmem:[#allocation47_spill] sm:$0xff]  ;;  %vm2234_vm5 = vcmp.ge.f32.partialorder %v1682_v9, 0.25  ;;  %v2235_v56 = vld [vmem:[#allocation48_spill] sm:$0xff] }
  0x95   :  { %vm2232_vm4 = vcmp.ge.f32.partialorder %v2231_v32, 0.25  ;;  %v375_v55 = vsel %vm2234_vm5, %v2233_v34, 0.0  ;;  %vm2236_vm6 = vcmp.ge.f32.partialorder %v1684_v10, 0.25  ;;  %v2237_v29 = vld [vmem:[#allocation49_spill] sm:$0xff]  ;;  %vm2238_vm7 = vcmp.ge.f32.partialorder %v1686_v11, 0.25  ;;  %434 = vst [vmem:[#allocation2 + $0x110] sm:$0xff] %v370_v23 }
  0x96   :  { %v374_v33 = vsel %vm2232_vm4, %v2230_v25, 0.0  ;;  %v376_v2 = vsel %vm2236_vm6, %v2235_v56, 0.0  ;;  %v377_v3 = vsel %vm2238_vm7, %v2237_v29, 0.0  ;;  %435 = vst [vmem:[#allocation2 + $0x118] sm:$0xff] %v371_v39  ;;  %436 = vst [vmem:[#allocation2 + $0x120] sm:$0xff] %v372_v49  ;;  %v2239_v41 = vld [vmem:[#allocation50_spill] sm:$0xff]  ;;  %v490_v29 = vlaneseq }
  0x97   :  { %437 = vst [vmem:[#allocation2 + $0x128] sm:$0xff] %v373_v59  ;;  %vm2240_vm8 = vcmp.ge.f32.partialorder %v1704_v18, 0.25  ;;  %v2241_v57 = vld [vmem:[#allocation51_spill] sm:$0xff]  ;;  %vm2242_vm9 = vcmp.ge.f32.partialorder %v1706_v19, 0.25  ;;  %v2243_v31 = vld [vmem:[#allocation52_spill] sm:$0xff]  ;;  %vm2244_vm10 = vcmp.ge.f32.partialorder %v1708_v20, 0.25 }
  0x98   :  { %v378_v4 = vsel %vm2240_vm8, %v2239_v41, 0.0  ;;  %v379_v9 = vsel %vm2242_vm9, %v2241_v57, 0.0  ;;  %v380_v10 = vsel %vm2244_vm10, %v2243_v31, 0.0  ;;  %v2245_v22 = vld [vmem:[#allocation53_spill] sm:$0xff]  ;;  %vm2246_vm2 = vcmp.ge.f32.partialorder %v1710_v21, 0.25  ;;  %438 = vst [vmem:[#allocation2 + $0x130] sm:$0xff] %v374_v33 }
  0x99   :  { %v381_v11 = vsel %vm2246_vm2, %v2245_v22, 0.0  ;;  %439 = vst [vmem:[#allocation2 + $0x138] sm:$0xff] %v375_v55  ;;  %440 = vst [vmem:[#allocation2 + $0x140] sm:$0xff] %v376_v2  ;;  %v473_v23 = vld [vmem:[#allocation9 + $0x8] sm:$0xff]  ;;  %v475_v18 = vld [vmem:[#allocation9 + $0x18] sm:$0xff]  ;;  %vm2247_vm3 = vcmp.ge.f32.partialorder %v1728_v16, 0.25 }
  0x9a   :  { %441 = vst [vmem:[#allocation2 + $0x148] sm:$0xff] %v377_v3  ;;  %v477_v24 = vld [vmem:[#allocation9 + $0x28] sm:$0xff]  ;;  %v479_v38 = vld [vmem:[#allocation9 + $0x38] sm:$0xff]  ;;  %v382_v19 = vsel %vm2247_vm3, %v1804_v30, 0.0  ;;  %vm2249_vm4 = vcmp.ge.f32.partialorder %v1730_v15, 0.25  ;;  %v2250_v40 = vld [vmem:[#allocation55_spill] sm:$0xff] }
  0x9b   :  { %v2248_v39 = vld [vmem:[#allocation54_spill] sm:$0xff]  ;;  %vm2251_vm5 = vcmp.ge.f32.partialorder %v1732_v7, 0.25  ;;  %vm2252_vm6 = vcmp.ge.f32.partialorder %v1734_v6, 0.25  ;;  %442 = vst [vmem:[#allocation2 + $0x150] sm:$0xff] %v378_v4  ;;  %443 = vst [vmem:[#allocation2 + $0x158] sm:$0xff] %v379_v9  ;;  %v472_v49 = vld [vmem:[#allocation9] sm:$0xff]  ;;  %v1163_v62 = vpack.c.bf16 %v477_v24, %v473_v23  ;;  %v1171_v63 = vpack.c.bf16 %v479_v38, %v475_v18 }
  0x9c   :  { %v383_v20 = vsel %vm2249_vm4, %v2248_v39, 0.0  ;;  %v384_v21 = vsel %vm2251_vm5, %v2250_v40, 0.0  ;;  %v385_v48 = vsel %vm2252_vm6, %v1821_v12, 0.0  ;;  %444 = vst [vmem:[#allocation2 + $0x160] sm:$0xff] %v380_v10  ;;  %445 = vst [vmem:[#allocation2 + $0x168] sm:$0xff] %v381_v11  ;;  %v476_v50 = vld [vmem:[#allocation9 + $0x20] sm:$0xff] }
  0x9d   :  { %v474_v16 = vld [vmem:[#allocation9 + $0x10] sm:$0xff]  ;;  %vm2253_vm7 = vcmp.ge.f32.partialorder %v1749_v5, 0.25  ;;  %v2254_v58 = vld [vmem:[#allocation56_spill] sm:$0xff]  ;;  %vm2255_vm8 = vcmp.ge.f32.partialorder %v1751_v60, 0.25  ;;  %vm2256_vm9 = vcmp.ge.f32.partialorder %v1753_v42, 0.25  ;;  %vm2257_vm10 = vcmp.ge.f32.partialorder %v1755_v43, 0.25  ;;  %1164 = vmatprep.subr.bf16.mxu0 %v1163_v62  ;;  %1172 = vmatprep.subr.bf16.mxu1 %v1171_v63 }
  0x9e   :  { %v478_v30 = vld [vmem:[#allocation9 + $0x30] sm:$0xff]  ;;  %v386_v15 = vsel %vm2253_vm7, %v1824_v13, 0.0  ;;  %v387_v7 = vsel %vm2255_vm8, %v2254_v58, 0.0  ;;  %v388_v6 = vsel %vm2256_vm9, %v1833_v17, 0.0  ;;  %v389_v12 = vsel %vm2257_vm10, %v1835_v0, 0.0  ;;  %446 = vst [vmem:[#allocation2 + $0x170] sm:$0xff] %v382_v19 }
  0x9f   :  { %447 = vst [vmem:[#allocation2 + $0x178] sm:$0xff] %v383_v20  ;;  %448 = vst [vmem:[#allocation2 + $0x180] sm:$0xff] %v384_v21  ;;  %v481_v59 = vld [vmem:[#allocation9 + $0x48] sm:$0xff]  ;;  %vm2258_vm2 = vcmp.ge.f32.partialorder %v1770_v44, 0.25  ;;  %v391_v60 = vsel %vm199_vm0, %v1843_v27, 0.0  ;;  %vm2259_vm3 = vcmp.ge.f32.partialorder %v1774_v52, 0.25 }
  0xa0   :  { %449 = vst [vmem:[#allocation2 + $0x188] sm:$0xff] %v385_v48  ;;  %v485_v25 = vld [vmem:[#allocation9 + $0x68] sm:$0xff]  ;;  %v390_v5 = vsel %vm2258_vm2, %v1837_v26, 0.0  ;;  %v392_v42 = vsel %vm2259_vm3, %v1845_v28, 0.0  ;;  %vm2260_vm4 = vcmp.ge.f32.partialorder %v1776_v53, 0.25  ;;  %450 = vst [vmem:[#allocation2 + $0x190] sm:$0xff] %v386_v15  ;;  %v1165_v28 = vpack.c.bf16 %v476_v50, %v472_v49 }
  0xa1   :  { %v393_v0 = vsel %vm2260_vm4, %v1847_v14, 0.0  ;;  %451 = vst [vmem:[#allocation2 + $0x198] sm:$0xff] %v387_v7  ;;  %452 = vst [vmem:[#allocation2 + $0x1a0] sm:$0xff] %v388_v6  ;;  %v483_v43 = vld [vmem:[#allocation9 + $0x58] sm:$0xff]  ;;  %v394_v44 = vsel %vm202_vm13, %v1853_v35, 0.0  ;;  %v396_v52 = vsel %vm204_vm15, %v1857_v37, 0.0  ;;  %v1173_v35 = vpack.c.bf16 %v478_v30, %v474_v16 }
  0xa2   :  { %453 = vst [vmem:[#allocation2 + $0x1a8] sm:$0xff] %v389_v12  ;;  %v487_v17 = vld [vmem:[#allocation9 + $0x78] sm:$0xff]  ;;  %v397_v53 = vsel %vm205_vm1, %v1863_v45, 0.0  ;;  %454 = vst [vmem:[#allocation2 + $0x1b0] sm:$0xff] %v390_v5  ;;  %v480_v13 = vld [vmem:[#allocation9 + $0x40] sm:$0xff]  ;;  %v399_v61 = vsel %vm207_vm12, %v1867_v47, 0.0  ;;  %v1167_v36 = vpack.c.bf16 %v485_v25, %v481_v59  ;;  %1166 = vmatpush1.bf16.msra.mxu0 %v1165_v28 }
  0xa3   :  { %455 = vst [vmem:[#allocation2 + $0x1b8] sm:$0xff] %v391_v60  ;;  %456 = vst [vmem:[#allocation2 + $0x1c0] sm:$0xff] %v392_v42  ;;  %v484_v14 = vld [vmem:[#allocation9 + $0x60] sm:$0xff]  ;;  %v482_v26 = vld [vmem:[#allocation9 + $0x50] sm:$0xff]  ;;  %v1175_v1 = vpack.c.bf16 %v487_v17, %v483_v43  ;;  %1174 = vmatpush1.bf16.msra.mxu1 %v1173_v35  ;;  %vm510_vm11 = vcmask 261120   ;;  %v2261_v46 = vmov 0.0  }
  0xa4   :  { %457 = vst [vmem:[#allocation2 + $0x1c8] sm:$0xff] %v393_v0  ;;  %458 = vst [vmem:[#allocation2 + $0x1d0] sm:$0xff] %v394_v44  ;;  %v486_v27 = vld [vmem:[#allocation9 + $0x70] sm:$0xff]  ;;  %v1169_v8 = vpack.c.bf16 %v484_v14, %v480_v13  ;;  %1168 = vmatprep.subr.bf16.mxu0 %v1167_v36  ;;  %v464_v45 = vld [vmem:[#allocation6] sm:$0xff]  ;;  %v491_v3 = vshrl.u32 %v490_v29, 7 }
  0xa5   :  { %459 = vst [vmem:[#allocation2 + $0x1d8] sm:$0xff] %v395_v51  ;;  %460 = vst [vmem:[#allocation2 + $0x1e0] sm:$0xff] %v396_v52  ;;  %v1177_v37 = vpack.c.bf16 %v486_v27, %v482_v26  ;;  %1176 = vmatprep.subr.bf16.mxu1 %v1175_v1  ;;  %v465_v47 = vld [vmem:[#allocation6 + $0x8] sm:$0xff]  ;;  %v466_v32 = vld [vmem:[#allocation6 + $0x10] sm:$0xff] }
  0xa6   :  { %461 = vst [vmem:[#allocation2 + $0x1e8] sm:$0xff] %v397_v53  ;;  %462 = vst [vmem:[#allocation2 + $0x1f0] sm:$0xff] %v398_v54  ;;  %1170 = vmatpush1.bf16.msra.mxu0 %v1169_v8  ;;  %v467_v33 = vld [vmem:[#allocation6 + $0x18] sm:$0xff]  ;;  %v468_v34 = vld [vmem:[#allocation6 + $0x20] sm:$0xff]  ;;  %v492_v41 = vsub.s32 0, %v491_v3  ;;  %v500_v4 = vsub.s32 2, %v491_v3 }
  0xa7   :  { %463 = vst [vmem:[#allocation2 + $0x1f8] sm:$0xff] %v399_v61  ;;  %1178 = vmatpush1.bf16.msra.mxu1 %v1177_v37  ;;  %v469_v55 = vld [vmem:[#allocation6 + $0x28] sm:$0xff]  ;;  %v470_v56 = vld [vmem:[#allocation6 + $0x30] sm:$0xff]  ;;  %v471_v2 = vld [vmem:[#allocation6 + $0x38] sm:$0xff]  ;;  %v496_v9 = vsub.s32 1, %v491_v3  ;;  %v504_v31 = vsub.s32 3, %v491_v3 }
  0xa8   :  { %v488_v57 = vld [vmem:[%s2144_s3] sm:$0xf]  ;;  %s2082_s3 = smov 0  }
  0xa9   :  { %1142 = vmatmul.mubr.msk.f32.vlgmr.msra.gmra.mrb[0].mxu0 %vm510_vm11, %v464_v45  ;;  %v2042_v10 = vrot.slane %v488_v57, %v492_v41  ;;  %v2044_v22 = vrot.slane %v488_v57, %v500_v4  ;;  %v2046_v11 = vrot.slane %v488_v57, %v496_v9  ;;  %v2048_v23 = vrot.slane %v488_v57, %v504_v31 }
  0xaa   :  { %1150 = vmatmul.mubr.msk.f32.vlgmr.msra.gmra.mrb[0].mxu1 %vm510_vm11, %v464_v45  ;;  %605 = vmatprep.mubr.f32.mxu0 %v2261_v46 }
  0xab   :  { %718 = vmatprep.mubr.f32.mxu1 %v2261_v46 }
  0xad   :  { %1143 = vmatmul.mubr.msk.f32.gmra.mrb[2].mxu0 %vm510_vm11, %v465_v47 }
  0xae   :  { %1151 = vmatmul.mubr.msk.f32.gmra.mrb[2].mxu1 %vm510_vm11, %v465_v47  ;;  %611 = vmatprep.mubr.f32.mxu0 %v2261_v46 }
  0xaf   :  { %724 = vmatprep.mubr.f32.mxu1 %v2261_v46 }
  0xb1   :  { %1144 = vmatmul.mubr.msk.f32.gmra.mrb[4].mxu0 %vm510_vm11, %v466_v32 }
  0xb2   :  { %1152 = vmatmul.mubr.msk.f32.gmra.mrb[4].mxu1 %vm510_vm11, %v466_v32  ;;  %617 = vmatprep.mubr.f32.mxu0 %v2261_v46 }
  0xb3   :  { %730 = vmatprep.mubr.f32.mxu1 %v2261_v46 }
  0xb5   :  { %1145 = vmatmul.mubr.msk.f32.gmra.mrb[6].mxu0 %vm510_vm11, %v467_v33 }
  0xb6   :  { %1153 = vmatmul.mubr.msk.f32.gmra.mrb[6].mxu1 %vm510_vm11, %v467_v33  ;;  %623 = vmatprep.mubr.f32.mxu0 %v2261_v46 }
  0xb7   :  { %736 = vmatprep.mubr.f32.mxu1 %v2261_v46 }
  0xb9   :  { %1146 = vmatmul.mubr.msk.f32.gmra.mrb[8].mxu0 %vm510_vm11, %v468_v34 }
  0xba   :  { %1154 = vmatmul.mubr.msk.f32.gmra.mrb[8].mxu1 %vm510_vm11, %v468_v34  ;;  %629 = vmatprep.mubr.f32.mxu0 %v2261_v46 }
  0xbb   :  { %742 = vmatprep.mubr.f32.mxu1 %v2261_v46 }
  0xbd   :  { %1147 = vmatmul.mubr.msk.f32.gmra.mrb[10].mxu0 %vm510_vm11, %v469_v55 }
  0xbe   :  { %1155 = vmatmul.mubr.msk.f32.gmra.mrb[10].mxu1 %vm510_vm11, %v469_v55  ;;  %635 = vmatprep.mubr.f32.mxu0 %v2261_v46 }
  0xbf   :  { %748 = vmatprep.mubr.f32.mxu1 %v2261_v46 }
  0xc1   :  { %1148 = vmatmul.mubr.msk.f32.gmra.mrb[12].mxu0 %vm510_vm11, %v470_v56 }
  0xc2   :  { %1156 = vmatmul.mubr.msk.f32.gmra.mrb[12].mxu1 %vm510_vm11, %v470_v56  ;;  %641 = vmatprep.mubr.f32.mxu0 %v2261_v46 }
  0xc3   :  { %754 = vmatprep.mubr.f32.mxu1 %v2261_v46 }
  0xc5   :  { %1149 = vmatmul.mubr.msk.f32.gmra.mrb[14].mxu0 %vm510_vm11, %v471_v2 }
  0xc6   :  { %1157 = vmatmul.mubr.msk.f32.gmra.mrb[14].mxu1 %vm510_vm11, %v471_v2 }
 0x17c   :  { %v601_v24 = vpop.f32.mrb[0].mxu0 }
 0x17d   :  { %v714_v18 = vpop.f32.mrb[0].mxu1  ;;  %v602_v38 = vadd.f32 %v601_v24, %v2042_v10  ;;  %v603_v39 = vpop.f32.mrb[1].mxu0 }
 0x17e   :  { %v715_v19 = vadd.f32 %v714_v18, %v2044_v22  ;;  %v716_v20 = vpop.f32.mrb[1].mxu1  ;;  %v604_v40 = vadd.f32 %v603_v39, %v2046_v11 }
 0x17f   :  { %v717_v21 = vadd.f32 %v716_v20, %v2048_v23  ;;  %761 = vst [vmem:[#allocation3] sm:$0xff] %v602_v38 }
 0x180   :  { %763 = vst [vmem:[#allocation3 + $0x10] sm:$0xff] %v715_v19  ;;  %762 = vst [vmem:[#allocation3 + $0x8] sm:$0xff] %v604_v40  ;;  %v607_v48 = vpop.f32.mrb[2].mxu0 }
 0x181   :  { %764 = vst [vmem:[#allocation3 + $0x18] sm:$0xff] %v717_v21  ;;  %v720_v49 = vpop.f32.mrb[2].mxu1  ;;  %v608_v50 = vadd.f32 %v607_v48, %v2042_v10  ;;  %v609_v30 = vpop.f32.mrb[3].mxu0 }
 0x182   :  { %v721_v16 = vadd.f32 %v720_v49, %v2044_v22  ;;  %v722_v15 = vpop.f32.mrb[3].mxu1  ;;  %v610_v58 = vadd.f32 %v609_v30, %v2046_v11 }
 0x183   :  { %v723_v7 = vadd.f32 %v722_v15, %v2048_v23  ;;  %765 = vst [vmem:[#allocation3 + $0x20] sm:$0xff] %v608_v50 }
 0x184   :  { %767 = vst [vmem:[#allocation3 + $0x30] sm:$0xff] %v721_v16  ;;  %766 = vst [vmem:[#allocation3 + $0x28] sm:$0xff] %v610_v58  ;;  %v613_v6 = vpop.f32.mrb[4].mxu0 }
 0x185   :  { %768 = vst [vmem:[#allocation3 + $0x38] sm:$0xff] %v723_v7  ;;  %v726_v12 = vpop.f32.mrb[4].mxu1  ;;  %v614_v59 = vadd.f32 %v613_v6, %v2042_v10  ;;  %v615_v5 = vpop.f32.mrb[5].mxu0 }
 0x186   :  { %v727_v25 = vadd.f32 %v726_v12, %v2044_v22  ;;  %v728_v60 = vpop.f32.mrb[5].mxu1  ;;  %v616_v42 = vadd.f32 %v615_v5, %v2046_v11 }
 0x187   :  { %v729_v0 = vadd.f32 %v728_v60, %v2048_v23  ;;  %769 = vst [vmem:[#allocation3 + $0x40] sm:$0xff] %v614_v59 }
 0x188   :  { %771 = vst [vmem:[#allocation3 + $0x50] sm:$0xff] %v727_v25  ;;  %770 = vst [vmem:[#allocation3 + $0x48] sm:$0xff] %v616_v42  ;;  %v619_v43 = vpop.f32.mrb[6].mxu0 }
 0x189   :  { %772 = vst [vmem:[#allocation3 + $0x58] sm:$0xff] %v729_v0  ;;  %v732_v17 = vpop.f32.mrb[6].mxu1  ;;  %v620_v44 = vadd.f32 %v619_v43, %v2042_v10  ;;  %v621_v52 = vpop.f32.mrb[7].mxu0 }
 0x18a   :  { %v733_v51 = vadd.f32 %v732_v17, %v2044_v22  ;;  %v734_v53 = vpop.f32.mrb[7].mxu1  ;;  %v622_v13 = vadd.f32 %v621_v52, %v2046_v11 }
 0x18b   :  { %v735_v54 = vadd.f32 %v734_v53, %v2048_v23  ;;  %773 = vst [vmem:[#allocation3 + $0x60] sm:$0xff] %v620_v44 }
 0x18c   :  { %775 = vst [vmem:[#allocation3 + $0x70] sm:$0xff] %v733_v51  ;;  %774 = vst [vmem:[#allocation3 + $0x68] sm:$0xff] %v622_v13  ;;  %v625_v61 = vpop.f32.mrb[8].mxu0 }
 0x18d   :  { %776 = vst [vmem:[#allocation3 + $0x78] sm:$0xff] %v735_v54  ;;  %v738_v62 = vpop.f32.mrb[8].mxu1  ;;  %v626_v63 = vadd.f32 %v625_v61, %v2042_v10  ;;  %v627_v26 = vpop.f32.mrb[9].mxu0 }
 0x18e   :  { %v739_v14 = vadd.f32 %v738_v62, %v2044_v22  ;;  %v740_v27 = vpop.f32.mrb[9].mxu1  ;;  %v628_v28 = vadd.f32 %v627_v26, %v2046_v11 }
 0x18f   :  { %v741_v35 = vadd.f32 %v740_v27, %v2048_v23  ;;  %777 = vst [vmem:[#allocation3 + $0x80] sm:$0xff] %v626_v63 }
 0x190   :  { %779 = vst [vmem:[#allocation3 + $0x90] sm:$0xff] %v739_v14  ;;  %778 = vst [vmem:[#allocation3 + $0x88] sm:$0xff] %v628_v28  ;;  %v631_v36 = vpop.f32.mrb[10].mxu0 }
 0x191   :  { %780 = vst [vmem:[#allocation3 + $0x98] sm:$0xff] %v741_v35  ;;  %v744_v1 = vpop.f32.mrb[10].mxu1  ;;  %v632_v8 = vadd.f32 %v631_v36, %v2042_v10  ;;  %v633_v45 = vpop.f32.mrb[11].mxu0 }
 0x192   :  { %v745_v37 = vadd.f32 %v744_v1, %v2044_v22  ;;  %v746_v46 = vpop.f32.mrb[11].mxu1  ;;  %v634_v47 = vadd.f32 %v633_v45, %v2046_v11 }
 0x193   :  { %v747_v32 = vadd.f32 %v746_v46, %v2048_v23  ;;  %781 = vst [vmem:[#allocation3 + $0xa0] sm:$0xff] %v632_v8 }
 0x194   :  { %783 = vst [vmem:[#allocation3 + $0xb0] sm:$0xff] %v745_v37  ;;  %782 = vst [vmem:[#allocation3 + $0xa8] sm:$0xff] %v634_v47  ;;  %v637_v33 = vpop.f32.mrb[12].mxu0 }
 0x195   :  { %784 = vst [vmem:[#allocation3 + $0xb8] sm:$0xff] %v747_v32  ;;  %v750_v34 = vpop.f32.mrb[12].mxu1  ;;  %v638_v55 = vadd.f32 %v637_v33, %v2042_v10  ;;  %v639_v2 = vpop.f32.mrb[13].mxu0 }
 0x196   :  { %v751_v56 = vadd.f32 %v750_v34, %v2044_v22  ;;  %v752_v29 = vpop.f32.mrb[13].mxu1  ;;  %v640_v3 = vadd.f32 %v639_v2, %v2046_v11 }
 0x197   :  { %v753_v41 = vadd.f32 %v752_v29, %v2048_v23  ;;  %785 = vst [vmem:[#allocation3 + $0xc0] sm:$0xff] %v638_v55 }
 0x198   :  { %787 = vst [vmem:[#allocation3 + $0xd0] sm:$0xff] %v751_v56  ;;  %786 = vst [vmem:[#allocation3 + $0xc8] sm:$0xff] %v640_v3  ;;  %v643_v4 = vpop.f32.mrb[14].mxu0 }
 0x199   :  { %788 = vst [vmem:[#allocation3 + $0xd8] sm:$0xff] %v753_v41  ;;  %v756_v57 = vpop.f32.mrb[14].mxu1  ;;  %v644_v9 = vadd.f32 %v643_v4, %v2042_v10  ;;  %v645_v24 = vpop.f32.mrb[15].mxu0 }
 0x19a   :  { %v757_v31 = vadd.f32 %v756_v57, %v2044_v22  ;;  %v758_v18 = vpop.f32.mrb[15].mxu1  ;;  %v646_v38 = vadd.f32 %v645_v24, %v2046_v11 }
 0x19b   :  { %v759_v19 = vadd.f32 %v758_v18, %v2048_v23  ;;  %789 = vst [vmem:[#allocation3 + $0xe0] sm:$0xff] %v644_v9 }
 0x19c   :  { %791 = vst [vmem:[#allocation3 + $0xf0] sm:$0xff] %v757_v31  ;;  %790 = vst [vmem:[#allocation3 + $0xe8] sm:$0xff] %v646_v38 }
 0x19d   :  { %792 = vst [vmem:[#allocation3 + $0xf8] sm:$0xff] %v759_v19 }
 0x19e LB: > { %v836_v10 = vld [vmem:[#allocation2 + $0x18] sm:$0xff]  ;;  %v835_v22 = vld [vmem:[#allocation2 + $0x10] sm:$0xff]  ;;  %v834_v21 = vld [vmem:[#allocation2 + $0x8] sm:$0xff]  ;;  %v1463_v48 = vmov 0.0   ;;  %s1158_s12 = sshll.u32 %s1452_s3, 3  ;;  %s821_s3 = sadd.s32 1, %s1452_s3   ;;  %s1452_s3 = sphi %s2082_s3, %s821_s3  }
 0x19f   : > { %v840_v39 = vld [vmem:[#allocation2 + $0x38] sm:$0xff]  ;;  %v839_v40 = vld [vmem:[#allocation2 + $0x30] sm:$0xff]  ;;  %v838_v11 = vld [vmem:[#allocation2 + $0x28] sm:$0xff]  ;;  %1032 = vmatprep.mubr.f32.mxu1 %v1463_v48  ;;  %961 = vmatprep.mubr.f32.mxu0 %v1463_v48  ;;  %s823_s30 = sshra.s32 %s1158_s12, 3  ;;  %s1081_s10 = scalar_lea.vmem [#allocation14], %s1158_s12 }
 0x1a0   : > { %v1211_v20 = vpack.c.bf16 %v840_v39, %v836_v10  ;;  %v1213_v23 = vpack.c.bf16 %v839_v40, %v835_v22  ;;  %v1179_v49 = vpack.c.bf16 %v838_v11, %v834_v21  ;;  %v844_v50 = vld [vmem:[#allocation2 + $0x58] sm:$0xff]  ;;  %v833_v30 = vld [vmem:[#allocation2] sm:$0xff]  ;;  %v843_v7 = vld [vmem:[#allocation2 + $0x50] sm:$0xff]  ;;  %s1162_s8 = sshll.u32 %s823_s30, 5  ;;  %p818_p4 = scmp.ge.s32.totalorder %s821_s3, 8  }
 0x1a1   : > { %v848_v16 = vld [vmem:[#allocation2 + $0x78] sm:$0xff]  ;;  %v837_v58 = vld [vmem:[#allocation2 + $0x20] sm:$0xff]  ;;  %v847_v6 = vld [vmem:[#allocation2 + $0x70] sm:$0xff]  ;;  %s827_s9 = scalar_lea.vmem [#allocation3], %s1162_s8  ;;  %s1464_s13 = smov (%p818_p4), [#allocation15]  }
 0x1a2   : > { %1212 = vmatprep.subr.bf16.mxu1 %v1211_v20  ;;  %v1215_v15 = vpack.c.bf16 %v848_v16, %v844_v50  ;;  %1180 = vmatprep.subr.bf16.mxu0 %v1179_v49  ;;  %v1181_v12 = vpack.c.bf16 %v837_v58, %v833_v30  ;;  %v1217_v59 = vpack.c.bf16 %v847_v6, %v843_v7  ;;  %v842_v25 = vld [vmem:[#allocation2 + $0x48] sm:$0xff]  ;;  %v852_v60 = vld [vmem:[#allocation2 + $0x98] sm:$0xff]  ;;  %v841_v43 = vld [vmem:[#allocation2 + $0x40] sm:$0xff]  ;;  %s1105_s14 = sshll.u32 (%p818_p4), %s1464_s13, 4  ;;  %s1465_s15 = smov (%p818_p4), [#allocation14]   ;;  %s1106_s14 = int_to_ptr.vmem [resolvable:$true] %s1105_s14 }
 0x1a3   : > { %1214 = vmatpush1.bf16.msra.mxu1 %v1213_v23  ;;  %v846_v5 = vld [vmem:[#allocation2 + $0x68] sm:$0xff]  ;;  %v856_v0 = vld [vmem:[#allocation2 + $0xb8] sm:$0xff]  ;;  %v845_v17 = vld [vmem:[#allocation2 + $0x60] sm:$0xff]  ;;  %s1092_s17 = sshll.u32 (%p818_p4), %s1465_s15, 4  ;;  %s1370_s18 = scalar_lea.vmem (%p818_p4), %s1106_s14, 128  ;;  %s2095_s17 = int_to_ptr.vmem [resolvable:$true] %s1092_s17 }
 0x1a4   : > { %1216 = vmatprep.subr.bf16.mxu1 %v1215_v15  ;;  %v1183_v42 = vpack.c.bf16 %v846_v5, %v842_v25  ;;  %1182 = vmatpush1.bf16.msra.mxu0 %v1181_v12  ;;  %v1219_v44 = vpack.c.bf16 %v856_v0, %v852_v60  ;;  %v1185_v51 = vpack.c.bf16 %v845_v17, %v841_v43  ;;  %v851_v52 = vld [vmem:[#allocation2 + $0x90] sm:$0xff]  ;;  %v850_v13 = vld [vmem:[#allocation2 + $0x88] sm:$0xff]  ;;  %v860_v61 = vld [vmem:[#allocation2 + $0xd8] sm:$0xff]  ;;  %p1371_p5 = scmp.ne.s32.totalorder (%p818_p4), %s1106_s14, %s1370_s18  ;;  %p1375_p6 = scmp.lt.s32.totalorder (%p818_p4), %s1106_s14, %s1106_s14 }
 0x1a5   : > { %v855_v53 = vld [vmem:[#allocation2 + $0xb0] sm:$0xff]  ;;  %v854_v54 = vld [vmem:[#allocation2 + $0xa8] sm:$0xff]  ;;  %v864_v62 = vld [vmem:[#allocation2 + $0xf8] sm:$0xff]  ;;  %p1376_p7 = scmp.lt.s32.totalorder (%p818_p4), %s1370_s18, %s1370_s18 }
 0x1a6   : > { %1184 = vmatprep.subr.bf16.mxu0 %v1183_v42  ;;  %v1221_v63 = vpack.c.bf16 %v855_v53, %v851_v52  ;;  %v1187_v14 = vpack.c.bf16 %v854_v54, %v850_v13  ;;  %v849_v26 = vld [vmem:[#allocation2 + $0x80] sm:$0xff]  ;;  %v859_v28 = vld [vmem:[#allocation2 + $0xd0] sm:$0xff]  ;;  %v1223_v35 = vpack.c.bf16 %v864_v62, %v860_v61  ;;  %v858_v1 = vld [vmem:[#allocation2 + $0xc8] sm:$0xff] }
 0x1a7   : > { %1218 = vmatpush1.bf16.msra.mxu1 %v1217_v59  ;;  %v853_v27 = vld [vmem:[#allocation2 + $0xa0] sm:$0xff]  ;;  %v863_v36 = vld [vmem:[#allocation2 + $0xf0] sm:$0xff]  ;;  %v862_v8 = vld [vmem:[#allocation2 + $0xe8] sm:$0xff]  ;;  %p1377_p8 = por (%p818_p4), %p1376_p7, %p1375_p6 }
 0x1a8   : > { %1220 = vmatprep.subr.bf16.mxu1 %v1219_v44  ;;  %1186 = vmatpush1.bf16.msra.mxu0 %v1185_v51  ;;  %v1189_v37 = vpack.c.bf16 %v853_v27, %v849_v26  ;;  %v868_v45 = vld [vmem:[#allocation2 + $0x118] sm:$0xff]  ;;  %v1191_v47 = vpack.c.bf16 %v862_v8, %v858_v1  ;;  %v857_v32 = vld [vmem:[#allocation2 + $0xc0] sm:$0xff]  ;;  %v1225_v34 = vpack.c.bf16 %v863_v36, %v859_v28  ;;  %v866_v55 = vld [vmem:[#allocation2 + $0x108] sm:$0xff] }
 0x1a9   : > { %v872_v46 = vld [vmem:[#allocation2 + $0x138] sm:$0xff]  ;;  %1188 = vmatprep.subr.bf16.mxu0 %v1187_v14  ;;  %v861_v33 = vld [vmem:[#allocation2 + $0xe0] sm:$0xff]  ;;  %v870_v56 = vld [vmem:[#allocation2 + $0x128] sm:$0xff]  ;;  %p1378_p9 = pnand (%p818_p4), %p1377_p8, %p1371_p5 }
 0x1aa   : > { %v1227_v2 = vpack.c.bf16 %v872_v46, %v868_v45  ;;  %v867_v29 = vld [vmem:[#allocation2 + $0x110] sm:$0xff]  ;;  %v1193_v41 = vpack.c.bf16 %v861_v33, %v857_v32  ;;  %v876_v4 = vld [vmem:[#allocation2 + $0x158] sm:$0xff]  ;;  %v1195_v9 = vpack.c.bf16 %v870_v56, %v866_v55  ;;  %v865_v31 = vld [vmem:[#allocation2 + $0x100] sm:$0xff] }
 0x1ab   : > { %1222 = vmatpush1.bf16.msra.mxu1 %v1221_v63  ;;  %v871_v3 = vld [vmem:[#allocation2 + $0x130] sm:$0xff]  ;;  %v880_v57 = vld [vmem:[#allocation2 + $0x178] sm:$0xff]  ;;  %v869_v24 = vld [vmem:[#allocation2 + $0x120] sm:$0xff] }
 0x1ac   : > { %1224 = vmatprep.subr.bf16.mxu1 %v1223_v35  ;;  %1190 = vmatpush1.bf16.msra.mxu0 %v1189_v37  ;;  %v1229_v18 = vpack.c.bf16 %v871_v3, %v867_v29  ;;  %v874_v38 = vld [vmem:[#allocation2 + $0x148] sm:$0xff]  ;;  %v1231_v10 = vpack.c.bf16 %v880_v57, %v876_v4  ;;  %v875_v39 = vld [vmem:[#allocation2 + $0x150] sm:$0xff]  ;;  %v1197_v20 = vpack.c.bf16 %v869_v24, %v865_v31  ;;  %v884_v40 = vld [vmem:[#allocation2 + $0x198] sm:$0xff] }
 0x1ad   : > { %1192 = vmatprep.subr.bf16.mxu0 %v1191_v47  ;;  %v878_v19 = vld [vmem:[#allocation2 + $0x168] sm:$0xff]  ;;  %v879_v22 = vld [vmem:[#allocation2 + $0x170] sm:$0xff]  ;;  %v888_v21 = vld [vmem:[#allocation2 + $0x1b8] sm:$0xff] }
 0x1ae   : > { %v1199_v11 = vpack.c.bf16 %v878_v19, %v874_v38  ;;  %v873_v48 = vld [vmem:[#allocation2 + $0x140] sm:$0xff]  ;;  %v1233_v49 = vpack.c.bf16 %v879_v22, %v875_v39  ;;  %v882_v50 = vld [vmem:[#allocation2 + $0x188] sm:$0xff]  ;;  %v1235_v30 = vpack.c.bf16 %v888_v21, %v884_v40  ;;  %v883_v15 = vld [vmem:[#allocation2 + $0x190] sm:$0xff] }
 0x1af   : > { %1226 = vmatpush1.bf16.msra.mxu1 %v1225_v34  ;;  %v877_v23 = vld [vmem:[#allocation2 + $0x160] sm:$0xff]  ;;  %v886_v16 = vld [vmem:[#allocation2 + $0x1a8] sm:$0xff]  ;;  %v887_v58 = vld [vmem:[#allocation2 + $0x1b0] sm:$0xff] }
 0x1b0   : > { %1228 = vmatprep.subr.bf16.mxu1 %v1227_v2  ;;  %1194 = vmatpush1.bf16.msra.mxu0 %v1193_v41  ;;  %v1201_v7 = vpack.c.bf16 %v877_v23, %v873_v48  ;;  %v892_v6 = vld [vmem:[#allocation2 + $0x1d8] sm:$0xff]  ;;  %v1203_v59 = vpack.c.bf16 %v886_v16, %v882_v50  ;;  %v881_v25 = vld [vmem:[#allocation2 + $0x180] sm:$0xff]  ;;  %v1237_v60 = vpack.c.bf16 %v887_v58, %v883_v15  ;;  %v890_v42 = vld [vmem:[#allocation2 + $0x1c8] sm:$0xff] }
 0x1b1   : > { %1196 = vmatprep.subr.bf16.mxu0 %v1195_v9  ;;  %v896_v12 = vld [vmem:[#allocation2 + $0x1f8] sm:$0xff]  ;;  %v885_v5 = vld [vmem:[#allocation2 + $0x1a0] sm:$0xff]  ;;  %v894_v0 = vld [vmem:[#allocation2 + $0x1e8] sm:$0xff] }
 0x1b2   : > { %v1239_v43 = vpack.c.bf16 %v896_v12, %v892_v6  ;;  %v891_v17 = vld [vmem:[#allocation2 + $0x1d0] sm:$0xff]  ;;  %v1205_v51 = vpack.c.bf16 %v885_v5, %v881_v25  ;;  %v1207_v52 = vpack.c.bf16 %v894_v0, %v890_v42  ;;  %v889_v53 = vld [vmem:[#allocation2 + $0x1c0] sm:$0xff]  ;;  %v829_v35 = vld [vmem:[%s827_s9 + $0x8] sm:$0xff] }
 0x1b3   : > { %1230 = vmatpush1.bf16.msra.mxu1 %v1229_v18  ;;  %v895_v44 = vld [vmem:[#allocation2 + $0x1f0] sm:$0xff]  ;;  %v893_v13 = vld [vmem:[#allocation2 + $0x1e0] sm:$0xff]  ;;  %v831_v32 = vld [vmem:[%s827_s9 + $0x18] sm:$0xff] }
 0x1b4   : > { %1232 = vmatprep.subr.bf16.mxu1 %v1231_v10  ;;  %1198 = vmatpush1.bf16.msra.mxu0 %v1197_v20  ;;  %v1241_v54 = vpack.c.bf16 %v895_v44, %v891_v17  ;;  %v1209_v61 = vpack.c.bf16 %v893_v13, %v889_v53  ;;  %v832_v62 = vld [vmem:[#allocation4] sm:$0xff]  ;;  %v830_v63 = vld [vmem:[%s827_s9 + $0x10] sm:$0xff]  ;;  %v1073_v19 = vld [vmem:[#allocation5] sm:$0xff] }
 0x1b5   : > { %1200 = vmatprep.subr.bf16.mxu0 %v1199_v11  ;;  %v828_v26 = vld [vmem:[%s827_s9] sm:$0xff] }
 0x1b7   : > { %1234 = vmatpush1.bf16.msra.mxu1 %v1233_v49 }
 0x1b8   : > { %1236 = vmatprep.subr.bf16.mxu1 %v1235_v30  ;;  %1202 = vmatpush1.bf16.msra.mxu0 %v1201_v7 }
 0x1b9   : > { %1204 = vmatprep.subr.bf16.mxu0 %v1203_v59 }
 0x1bb   : > { %1238 = vmatpush1.bf16.msra.mxu1 %v1237_v60 }
 0x1bc   : > { %1240 = vmatprep.subr.bf16.mxu1 %v1239_v43  ;;  %1206 = vmatpush1.bf16.msra.mxu0 %v1205_v51 }
 0x1bd   : > { %1208 = vmatprep.subr.bf16.mxu0 %v1207_v52 }
 0x1bf   : > { %1242 = vmatpush1.bf16.msra.mxu1 %v1241_v54 }
 0x1c0   : > { %1210 = vmatpush1.bf16.msra.mxu0 %v1209_v61 }
 0x1c2   : > { %1033 = vmatmul.mubr.f32.vlgmr.msra.gmra.mrb[0].mxu1 %v832_v62 }
 0x1c3   : > { %962 = vmatmul.mubr.f32.vlgmr.msra.gmra.mrb[0].mxu0 %v832_v62 }
 0x295   : > { %v1034_v14 = vpop.f32.mrb[0].mxu1 }
 0x296   : > { %v1041_v27 = vadd.f32 %v1034_v14, %v830_v63  ;;  %v1036_v28 = vpop.f32.mrb[1].mxu1  ;;  %v963_v36 = vpop.f32.mrb[0].mxu0 }
 0x297   : > { %v1039_v8 = vadd.f32 %v963_v36, %v828_v26  ;;  %v965_v37 = vpop.f32.mrb[1].mxu0  ;;  %v1042_v2 = vadd.f32 %v1036_v28, %v831_v32 }
 0x298   : > { %v1045_v1 = vmul.f32 2.0, %v1041_v27  ;;  %v1040_v45 = vadd.f32 %v965_v37, %v829_v35 }
 0x299   : > { %v1047_v47 = vsub.f32 0.0, %v1039_v8  ;;  %v1050_v29 = vsub.f32 0.0, %v1042_v2 }
 0x29a   : > { %v1049_v46 = vsub.f32 0.0, %v1045_v1  ;;  %v1048_v33 = vsub.f32 0.0, %v1040_v45 }
 0x29b   : > { %v1051_v55 = vmul.f32 1.442695, %v1047_v47  ;;  %v1057_v3 = vmul.f32 1.442695, %v1050_v29 }
 0x29c   : > { %v1055_v34 = vmul.f32 1.442695, %v1049_v46  ;;  %v1053_v56 = vmul.f32 1.442695, %v1048_v33 }
 0x29e   : > { %1264 = vpow2.f32 %v1055_v34 }
 0x29f   : > { %1266 = vpow2.f32 %v1051_v55 }
 0x2a0   : > { %1268 = vpow2.f32 %v1053_v56 }
 0x2a1   : > { %1270 = vpow2.f32 %v1057_v3 }
 0x2a8   : > { %v1265_v41 = vpop.eup %1264 }
 0x2a9   : > { %v1267_v4 = vpop.eup %1266  ;;  %v1061_v57 = vadd.f32 1.0, %v1265_v41 }
 0x2aa   : > { %v1269_v9 = vpop.eup %1268  ;;  %v1059_v31 = vadd.f32 1.0, %v1267_v4 }
 0x2ab   : > { %1272 = vrcp.f32 %v1061_v57  ;;  %v1060_v24 = vadd.f32 1.0, %v1269_v9  ;;  %v1271_v18 = vpop.eup %1270 }
 0x2ac   : > { %1274 = vrcp.f32 %v1059_v31  ;;  %v1062_v21 = vadd.f32 1.0, %v1271_v18 }
 0x2ad   : > { %1276 = vrcp.f32 %v1060_v24 }
 0x2ae   : > { %1278 = vrcp.f32 %v1062_v21 }
 0x2b5   : > { %v1273_v38 = vpop.eup %1272 }
 0x2b6   : > { %v1275_v10 = vpop.eup %1274  ;;  %v1071_v39 = vmul.f32 2.0, %v1273_v38 }
 0x2b7   : > { %v1277_v22 = vpop.eup %1276 }
 0x2b8   : > { %v1161_v20 = vadd.f32 -1.0, %v1071_v39  ;;  %v1074_v40 = vmul.f32 %v1277_v22, %v1073_v19  ;;  %v1279_v23 = vpop.eup %1278 }
 0x2ba   : > { %v1075_v11 = vmul.f32 %v1275_v10, %v1161_v20 }
 0x2bc   : > { %v1076_v48 = vadd.f32 %v1075_v11, %v1074_v40 }
 0x2be   : > { %1280 = vtanh.f32 %v1076_v48  ;;  %1079 = vst [vmem:[#allocation5] sm:$0xff] %v1076_v48 }
 0x2c5   :  { %820 = sbr.rel (!%p818_p4) target bundleno = 414 (0x19e), region = 81  ;;  %v1085_v30 = vld [vmem:[#allocation5] sm:$0xff] (%p818_p4) }
 0x2c6   :  { %1086 = vst [vmem:[#allocation17] sm:$0xff] (%p818_p4), %v1085_v30 }
 0x2c8   : > { %v1281_v49 = vpop.eup %1280 }
 0x2c9   : > { %v1078_v50 = vmul.f32 %v1281_v49, %v1279_v23 }
 0x2cb   : > { %1080 = vst [vmem:[#allocation4] sm:$0xff] %v1078_v50  ;;  %1082 = vst [vmem:[%s1081_s10] sm:$0xff] %v1078_v50 }
 0x2d2   :  { %v1083_v16 = vld [vmem:[#allocation4] sm:$0xff] }
 0x2d3   :  { %1084 = vst [vmem:[#allocation15] sm:$0xff] %v1083_v16 }
 0x2d4   :  { %1381 = shalt.err (!%p1378_p9)
}
 0x2d5   :  { %s1382_s19 = scalar_lea.hbm %s2147_s6, 128 }
 0x2d6   :  { %p1383_p10 = scmp.ne.s32.totalorder %s2147_s6, %s1382_s19  ;;  %p1386_p11 = scmp.lt.u32.totalorder %s1382_s19, %s2147_s6 }
 0x2d8   :  { %p1388_p12 = pnand %p1386_p11, %p1383_p10 }
 0x2da   :  { %1391 = shalt.err (!%p1388_p12)
}
 0x2db   :  { %1108 = dma.vmem_to_hbm [thread:$0]  %s1106_s14, 128, %s2147_s6, [#allocation16]  }
 0x2dc   :  { %s1392_s27 = scalar_lea.vmem %s2095_s17, 1024  ;;  %p1397_p0 = scmp.lt.s32.totalorder %s2095_s17, %s2095_s17 }
 0x2dd   :  { %p1393_p13 = scmp.ne.s32.totalorder %s2095_s17, %s1392_s27  ;;  %p1398_p1 = scmp.lt.s32.totalorder %s1392_s27, %s1392_s27 }
 0x2df   :  { %p1399_p2 = por %p1398_p1, %p1397_p0 }
 0x2e1   :  { %p1400_p3 = pnand %p1399_p2, %p1393_p13 }
 0x2e3   :  { %1403 = shalt.err (!%p1400_p3)
}
 0x2e4   :  { %s1404_s29 = scalar_lea.hbm %s2146_s5, 1024 }
 0x2e5   :  { %p1405_p4 = scmp.ne.s32.totalorder %s2146_s5, %s1404_s29  ;;  %p1408_p5 = scmp.lt.u32.totalorder %s1404_s29, %s2146_s5 }
 0x2e7   :  { %p1410_p6 = pnand %p1408_p5, %p1405_p4 }
 0x2e9   :  { %1413 = shalt.err (!%p1410_p6)
}
 0x2ea   :  { %1098 = dma.vmem_to_hbm [thread:$0]  %s2095_s17, 1024, %s2146_s5, [#allocation8], %s1458_s1, %s1458_s1, %s1459_s25  }
 0x2eb   :  { %s1466_s8 = smov [#allocation17]  }
 0x2ec   :  { %s1115_s9 = sshll.u32 %s1466_s8, 4  ;;  %s1116_s9 = int_to_ptr.vmem [resolvable:$true] %s1115_s9 }
 0x2ed   :  { %s1414_s10 = scalar_lea.vmem %s1116_s9, 128  ;;  %p1419_p8 = scmp.lt.s32.totalorder %s1116_s9, %s1116_s9 }
 0x2ee   :  { %p1415_p7 = scmp.ne.s32.totalorder %s1116_s9, %s1414_s10  ;;  %p1420_p9 = scmp.lt.s32.totalorder %s1414_s10, %s1414_s10 }
 0x2f0   :  { %p1421_p10 = por %p1420_p9, %p1419_p8 }
 0x2f2   :  { %p1422_p11 = pnand %p1421_p10, %p1415_p7 }
 0x2f4   :  { %1425 = shalt.err (!%p1422_p11)
}
 0x2f5   :  { %s1426_s15 = scalar_lea.hbm %s2148_s7, 128 }
 0x2f6   :  { %p1427_p12 = scmp.ne.s32.totalorder %s2148_s7, %s1426_s15  ;;  %p1430_p13 = scmp.lt.u32.totalorder %s1426_s15, %s2148_s7 }
 0x2f8   :  { %p1432_p0 = pnand %p1430_p13, %p1427_p12 }
 0x2fa   :  { %1435 = shalt.err (!%p1432_p0)
}
 0x2fb   :  { %1118 = dma.vmem_to_hbm [thread:$0]  %s1116_s9, 128, %s2148_s7, [#allocation16]  }
 0x2fc   :  { %1446 = dma.done.wait [#allocation8], 1024  }
 0x2fd   :  { %1447 = vsyncadd [#allocation8], 4294966272 }
 0x2fe   :  { %1448 = dma.done.wait [#allocation16], 256  }
 0x2ff   :  { %1449 = vsyncadd [#allocation16], 4294967040 }
 0x300   :  { %1128 = vsyncpa [#allocation7], 1 }
 0x301   :  { %1129 = vsyncpa [#allocation10], 1 }
 0x302   :  { %1130 = vsyncpa [#allocation13], 1 }
 0x303   :  { %1131 = vsyncpa [#allocation8], 1 }
 0x304   :  { %1132 = vsyncpa [#allocation16], 1 }

</bundles_post_ra>
